<compile_context>
chip_gen: v5e
topology: v5e:2x2
jax: 0.10.0
libtpu: 0.0.40
codegen_flags: <defaults>
</compile_context>

<pallas_src>
import jax
import jax.numpy as jnp
from jax.experimental import pallas as pl
from jax.experimental.pallas import tpu as pltpu

STATE_DIM = 16
HIDDEN = 128


def _round_up(x, m):
    return ((x + m - 1) // m) * m


def _make_value_kernel(tile_batch, chunk):
    """Kernel factory; `tile_batch` rows per grid step, `chunk` rows per inner step."""
    n_chunks = tile_batch // chunk
    out_rows_per_chunk = chunk // 128

    def kernel(x_ref, w1_ref, b1_ref, w2_ref, b2_ref, o_ref):
        # x_ref          : (TB, 2D)  bf16        w1_ref : (2D, H) bf16
        # b1_ref, w2_ref : (1, H)    f32         b2_ref : (1,)    f32 (SMEM)
        # o_ref          : (TB//128, 128) f32    lane-dense batch slab
        w1 = w1_ref[...]          # hoisted: weights are tiny and VMEM-resident
        b1 = b1_ref[...]
        w2 = w2_ref[...]
        b2 = b2_ref[0]

        @pl.loop(0, n_chunks)
        def _(c):
            r = pl.multiple_of(c * chunk, chunk)
            x = x_ref[pl.ds(r, chunk), :]                      # (chunk, 2D) bf16
            h = jnp.dot(x, w1, preferred_element_type=jnp.float32)
            h = jnp.maximum(h + b1, 0.0)                       # (chunk, H) f32
            # Layer 2 (H -> 1): VPU multiply + lane reduction, keeps MXU free
            # and avoids a degenerate width-1 result tile.
            v = jnp.sum(h * w2, axis=-1) + b2                  # (chunk,) f32
            orow = pl.multiple_of(c * out_rows_per_chunk, out_rows_per_chunk)
            o_ref[pl.ds(orow, out_rows_per_chunk), :] = v.reshape(
                out_rows_per_chunk, 128)

    return kernel


def lightweight_value_network(state, goal, params, *,
                              min_pallas_batch=4096, tile_batch=None):
    """Pallas implementation of LightweightValueNetwork.forward.

    state, goal : (B, state_dim) or (state_dim,)
    params      : (w1, b1, w2, b2) from init_params()  (w1 is (2*state_dim, H), bf16)
    returns     : (B,) float32 value per batch element (last dim squeezed)
    """
    if state.ndim == 1:
        state = state[None, :]
    if goal.ndim == 1:
        goal = goal[None, :]
    if state.shape[-1] != goal.shape[-1]:
        raise ValueError(
            f"State and goal dimensions must match: {state.shape} vs {goal.shape}")

    w1, b1, w2, b2 = params
    combined_dim = state.shape[-1] + goal.shape[-1]
    if combined_dim != w1.shape[0]:
        raise ValueError(
            f"Combined state+goal has dimension {combined_dim}, but network "
            f"expects {w1.shape[0]}. State: {state.shape}, Goal: {goal.shape}")

    B = state.shape[0]
    D2, H = w1.shape

    # Single wrapper materialization: concat + cast fuse into one XLA pass
    # (read 2x f32, write 1x bf16). Ideally the producer emits this directly.
    x = jnp.concatenate([state, goal], axis=-1).astype(w1.dtype)

    if tile_batch is None and B < min_pallas_batch:
        # Small-batch fast path: the pallas launch + pipeline prologue would
        # dominate; fused XLA is strictly better here.
        h = jnp.maximum(
            jnp.dot(x, w1, preferred_element_type=jnp.float32) + b1, 0.0)
        return jnp.sum(h * w2, axis=-1) + b2[0]

    # ---- batch tiling --------------------------------------------------------
    # TB is a multiple of 1024 so each output block (TB//128, 128) has a
    # sublane-dim multiple of 8.  Cap at 32768: the lane-padded input block is
    # TB*128*2 B = 8 MiB (16 MiB double-buffered), which amortizes the ~0.35us
    # per-step overhead on v5e/v6e/v7x while fitting v7x's 64 MiB VMEM.
    # nb >= 2 so the "parallel" grid axis splits across both v7x TensorCores.
    if tile_batch is None:
        TB = min(32768, _round_up(int(pl.cdiv(B, 2)), 1024))
    else:
        TB = _round_up(max(int(tile_batch), 1), 1024)
    nb = int(pl.cdiv(B, TB))
    chunk = 2048 if TB % 2048 == 0 else 1024        # inner compute chunk (rows)

    out_rows = nb * TB // 128                        # lane-dense output slab rows

    itemsize = jnp.dtype(x.dtype).itemsize
    # Lane-padded, double-buffered VMEM footprint + slack for chunk temporaries,
    # weights and scheduling headroom; capped below v7x's 64 MiB physical VMEM.
    in_buf = TB * 128 * itemsize
    out_buf = (TB // 128) * 128 * 4
    vmem_limit = int(min(2 * (in_buf + out_buf) + (8 << 20), 48 << 20))

    cost = pl.CostEstimate(
        flops=2 * nb * TB * D2 * H + 3 * nb * TB * H,
        transcendentals=0,
        bytes_accessed=(nb * TB * (D2 * itemsize + 4)       # x read, f32 slab write
                        + D2 * H * itemsize + 2 * H * 4 + 4),
    )

    kernel = _make_value_kernel(TB, chunk)

    out = pl.pallas_call(
        kernel,
        out_shape=jax.ShapeDtypeStruct((out_rows, 128), jnp.float32),
        grid=(nb,),
        in_specs=[
            pl.BlockSpec((TB, D2), lambda i: (i, 0)),            # fused state+goal tile
            pl.BlockSpec((D2, H), lambda i: (0, 0)),             # W1, VMEM-resident
            pl.BlockSpec((1, H), lambda i: (0, 0)),              # b1, resident
            pl.BlockSpec((1, H), lambda i: (0, 0)),              # w2 row, resident
            pl.BlockSpec(memory_space=pltpu.MemorySpace.SMEM),   # b2 scalar
        ],
        out_specs=pl.BlockSpec((TB // 128, 128), lambda i: (i, 0)),
        compiler_params=pltpu.CompilerParams(
            dimension_semantics=("parallel",),
            vmem_limit_bytes=vmem_limit),
        cost_estimate=cost,
    )(x, w1, b1, w2, b2)

    # Lane-dense slab -> (B,); row-major flatten preserves batch order.
    # Rows >= B come from the partial last input block and may be garbage —
    # they MUST stay sliced off (never reduce over the full padded slab).
    return out.reshape(-1)[:B]


def init_params(key, state_dim=STATE_DIM, hidden=HIDDEN):
    """Deterministic init mimicking nn.Linear defaults (U(+/- 1/sqrt(fan_in))).

    W1 is stored transposed (in, out) in bf16 so the kernel computes x @ W1;
    W2 as a (1, H) f32 row for the VPU layer-2 reduction; b2 as a (1,) f32
    scalar (lives in SMEM inside the kernel).
    """
    k1, k2, k3, k4 = jax.random.split(key, 4)
    in1 = 2 * state_dim
    bound1 = 1.0 / (in1 ** 0.5)
    bound2 = 1.0 / (hidden ** 0.5)
    w1 = jax.random.uniform(k1, (in1, hidden), jnp.float32, -bound1, bound1)
    b1 = jax.random.uniform(k2, (1, hidden), jnp.float32, -bound1, bound1)
    w2 = jax.random.uniform(k3, (1, hidden), jnp.float32, -bound2, bound2)
    b2 = jax.random.uniform(k4, (1,), jnp.float32, -bound2, bound2)
    return (w1.astype(jnp.bfloat16), b1, w2, b2)


if __name__ == "__main__":
    key = jax.random.PRNGKey(0)
    kp, ks1, kg1, ks2, kg2 = jax.random.split(key, 5)
    params = init_params(kp)

    def ref_forward(state, goal, params):
        # Pure-JAX reference with the same bf16 inputs / f32 accumulation.
        w1, b1, w2, b2 = params
        xc = jnp.concatenate([state, goal], axis=-1).astype(w1.dtype)
        h = jnp.maximum(
            jnp.dot(xc, w1, preferred_element_type=jnp.float32) + b1, 0.0)
        return jnp.sum(h * w2, axis=-1) + b2[0]

    # 1) Module-typical tiny batch -> small-B jnp fast path.
    B1 = 2
    s1 = jax.random.normal(ks1, (B1, STATE_DIM), jnp.float32)
    g1 = jax.random.normal(kg1, (B1, STATE_DIM), jnp.float32)
    v1 = jax.block_until_ready(lightweight_value_network(s1, g1, params))
    assert v1.shape == (B1,)
    assert jnp.allclose(v1, ref_forward(s1, g1, params), atol=2e-3, rtol=2e-3)

    # 2) Batch just large enough to take the Pallas path: TB=3072, nb=2 grid
    #    blocks, 3-chunk inner loop, partial tail block (4333 - 3072 = 1261
    #    valid rows in the last block).
    B2 = 4333
    s2 = jax.random.normal(ks2, (B2, STATE_DIM), jnp.float32)
    g2 = jax.random.normal(kg2, (B2, STATE_DIM), jnp.float32)
    v2 = jax.block_until_ready(lightweight_value_network(s2, g2, params))
    ref2 = ref_forward(s2, g2, params)
    assert v2.shape == (B2,)
    assert jnp.allclose(v2, ref2, atol=2e-3, rtol=2e-3), (
        float(jnp.max(jnp.abs(v2 - ref2))))

    print("KERNEL_OK")
</pallas_src>

<mosaic_0001>
module attributes {stable_mosaic.version = 11 : i64} {
  func.func @kernel(%arg0: i32, %arg1: memref<3072x32xbf16, #tpu.memory_space<vmem>>, %arg2: memref<32x128xbf16, #tpu.memory_space<vmem>>, %arg3: memref<1x128xf32, #tpu.memory_space<vmem>>, %arg4: memref<1x128xf32, #tpu.memory_space<vmem>>, %arg5: memref<1xf32, #tpu.memory_space<smem>>, %arg6: memref<24x128xf32, #tpu.memory_space<vmem>>) attributes {dimension_semantics = [#tpu.dimension_semantics<parallel>], iteration_bounds = array<i64: 2>, scalar_prefetch = 0 : i64, scratch_operands = 0 : i64, tpu.core_type = #tpu.core_type<tc>, window_params = [{transform_indices = @transform_0, window_bounds = array<i64: 3072, 32>}, {pipeline_mode = #tpu.pipeline_mode<synchronous>, transform_indices = @transform_1, window_bounds = array<i64: 32, 128>}, {pipeline_mode = #tpu.pipeline_mode<synchronous>, transform_indices = @transform_2, window_bounds = array<i64: 1, 128>}, {pipeline_mode = #tpu.pipeline_mode<synchronous>, transform_indices = @transform_3, window_bounds = array<i64: 1, 128>}, {transform_indices = @transform_4, window_bounds = array<i64: 1>}, {transform_indices = @transform_5, window_bounds = array<i64: 24, 128>}]} {
    %c0 = arith.constant 0 : index
    %c0_0 = arith.constant 0 : index
    %0 = vector.load %arg2[%c0, %c0_0] : memref<32x128xbf16, #tpu.memory_space<vmem>>, vector<32x128xbf16>
    %c0_1 = arith.constant 0 : index
    %c0_2 = arith.constant 0 : index
    %1 = vector.load %arg3[%c0_1, %c0_2] : memref<1x128xf32, #tpu.memory_space<vmem>>, vector<1x128xf32>
    %c0_3 = arith.constant 0 : index
    %c0_4 = arith.constant 0 : index
    %2 = vector.load %arg4[%c0_3, %c0_4] : memref<1x128xf32, #tpu.memory_space<vmem>>, vector<1x128xf32>
    %c0_5 = arith.constant 0 : index
    %3 = memref.load %arg5[%c0_5] : memref<1xf32, #tpu.memory_space<smem>>
    %c0_i32 = arith.constant 0 : i32
    %c3_i32 = arith.constant 3 : i32
    %4 = arith.addi %c0_i32, %c3_i32 : i32
    %c1_i32 = arith.constant 1 : i32
    scf.for %arg7 = %c0_i32 to %4 step %c1_i32  : i32 {
      %c1_i32_7 = arith.constant 1 : i32
      %5 = arith.muli %arg7, %c1_i32_7 : i32
      %c0_i32_8 = arith.constant 0 : i32
      %6 = arith.addi %c0_i32_8, %5 : i32
      %c1024_i32 = arith.constant 1024 : i32
      %7 = arith.muli %6, %c1024_i32 : i32
      %8 = tpu.assume_multiple %7, 1024 : i32
      %9 = arith.index_cast %8 : i32 to index
      %c0_9 = arith.constant 0 : index
      %10 = vector.load %arg1[%9, %c0_9] : memref<3072x32xbf16, #tpu.memory_space<vmem>>, vector<1024x32xbf16>
      %cst = arith.constant dense<0.000000e+00> : vector<1024x128xf32>
      %11 = tpu.matmul %10, %0, %cst {dimension_numbers = #tpu.dot_dimension_numbers<[1], [0], [0], [1], [0, 0, 1, 1], [], []>} : vector<1024x32xbf16>, vector<32x128xbf16>, vector<1024x128xf32> -> vector<1024x128xf32>
      %12 = vector.broadcast %1 : vector<1x128xf32> to vector<1024x128xf32>
      %13 = arith.addf %11, %12 : vector<1024x128xf32>
      %cst_10 = arith.constant 0.000000e+00 : f32
      %14 = vector.broadcast %cst_10 : f32 to vector<1024x128xf32>
      %15 = arith.maximumf %13, %14 : vector<1024x128xf32>
      %16 = vector.broadcast %2 : vector<1x128xf32> to vector<1024x128xf32>
      %17 = arith.mulf %15, %16 : vector<1024x128xf32>
      %cst_11 = arith.constant dense<0.000000e+00> : vector<1024xf32>
      %18 = vector.multi_reduction <add>, %17, %cst_11 [1] : vector<1024x128xf32> to vector<1024xf32>
      %19 = vector.broadcast %3 : f32 to vector<1024xf32>
      %20 = arith.addf %18, %19 : vector<1024xf32>
      %c8_i32 = arith.constant 8 : i32
      %21 = arith.muli %6, %c8_i32 : i32
      %22 = tpu.assume_multiple %21, 8 : i32
      %23 = vector.shape_cast %20 : vector<1024xf32> to vector<8x128xf32>
      %24 = arith.index_cast %22 : i32 to index
      %c0_12 = arith.constant 0 : index
      %25 = vector.load %arg6[%24, %c0_12] : memref<24x128xf32, #tpu.memory_space<vmem>>, vector<8x128xf32>
      tpu.vector_store %arg6[%24, %c0_12], %23 {strides = array<i32>} : memref<24x128xf32, #tpu.memory_space<vmem>>, vector<8x128xf32>,
    }
    %c3_i32_6 = arith.constant 3 : i32
    return
  }
  func.func @transform_0(%arg0: i32) -> (i32, i32) {
    %c0_i32 = arith.constant 0 : i32
    %c0_i32_0 = arith.constant 0 : i32
    return %arg0, %c0_i32 : i32, i32
  }
  func.func @transform_1(%arg0: i32) -> (i32, i32) {
    %c0_i32 = arith.constant 0 : i32
    %c0_i32_0 = arith.constant 0 : i32
    %c0_i32_1 = arith.constant 0 : i32
    return %c0_i32, %c0_i32_0 : i32, i32
  }
  func.func @transform_2(%arg0: i32) -> (i32, i32) {
    %c0_i32 = arith.constant 0 : i32
    %c0_i32_0 = arith.constant 0 : i32
    %c0_i32_1 = arith.constant 0 : i32
    return %c0_i32, %c0_i32_0 : i32, i32
  }
  func.func @transform_3(%arg0: i32) -> (i32, i32) {
    %c0_i32 = arith.constant 0 : i32
    %c0_i32_0 = arith.constant 0 : i32
    %c0_i32_1 = arith.constant 0 : i32
    return %c0_i32, %c0_i32_0 : i32, i32
  }
  func.func @transform_4(%arg0: i32) -> i32 {
    %c0_i32 = arith.constant 0 : i32
    %c0_i32_0 = arith.constant 0 : i32
    return %c0_i32 : i32
  }
  func.func @transform_5(%arg0: i32) -> (i32, i32) {
    %c0_i32 = arith.constant 0 : i32
    %c0_i32_0 = arith.constant 0 : i32
    return %arg0, %c0_i32 : i32, i32
  }
}

</mosaic_0001>

<bundles_post_ra>
// kernel: tpu_custom_call.1
= control target key start
LH: loop header
LB: loop body
LE: loop exit
PB: predicated region body
PF: predicated region fallthrough
CT: control target
= control target key end

     0   :  { %s3991_s0 = inlined_call_operand.vmem [shape: bf16[4333,32], index: 0, kind: input, shape index: {}]   ;;  %s3992_s1 = inlined_call_operand.vmem [shape: bf16[32,128], index: 1, kind: input, shape index: {}]   ;;  %s3993_s2 = inlined_call_operand.vmem [shape: f32[1,128], index: 2, kind: input, shape index: {}]   ;;  %s3994_s3 = inlined_call_operand.vmem [shape: f32[1,128], index: 3, kind: input, shape index: {}]   ;;  %s3995_s4 = inlined_call_operand.<no memory space> [shape: f32[1], index: 4, kind: input, shape index: {}]   ;;  %s3996_s5 = inlined_call_operand.hbm [shape: f32[48,128], index: 5, kind: output, shape index: {}]  }
   0x1   :  { %10 = sst [smem:[#allocation2]] %s3995_s4 }
   0x2   :  { %11 = vsyncpa [#allocation4], 0 }
   0x3   :  { %13 = vsyncpa [#allocation4 + $0x1], 0  ;;  %s2977_s20 = smov 0   ;;  %s2979_s21 = smov 0  }
   0x4   :  { %s2981_s22 = smov 0   ;;  %s2983_s23 = smov 0  }
   0x5 LB: > { %s2998_s4 = sadd.s32 4294967295, %s2936_s23   ;;  %s2408_s24 = sadd.s32 4294967294, %s2936_s23   ;;  %s2936_s23 = sphi %s2983_s23, %s4002_s23   ;;  %s2932_s22 = sphi %s2981_s22, %s4001_s22   ;;  %s2928_s21 = sphi %s2979_s21, %s4000_s21   ;;  %s2924_s20 = sphi %s2977_s20, %s3999_s20  }
   0x6   : > { %s3002_s25 = sadd.s32 1, %s2936_s23   ;;  %s136_s26 = sadd.s32 1, %s2932_s22 }
   0x7   : > { %s133_s27 = ssub.s32 %s2936_s23, %s3002_s25  ;;  %p146_p0 = scmp.ne.s32.totalorder %s2932_s22, %s2928_s21 }
   0x8   : > { %p134_p1 = scmp.eq.s32.totalorder %s133_s27, 0  ;;  %p147_p2 = scmp.eq.s32.totalorder %s2998_s4, 1 }
   0x9   : > { %p152_p3 = scmp.ne.s32.totalorder %s2928_s21, %s2924_s20  ;;  %p153_p4 = scmp.eq.s32.totalorder %s2408_s24, 1 }
   0xa   : > { %s3013_s28 = scalar_select %p134_p1, %s2932_s22, %s136_s26  }
   0xb   : > { %p3015_p5 = por %p147_p2, %p146_p0  ;;  %p3019_p6 = por %p153_p4, %p152_p3 }
   0xc   : > { %p2411_p7 = scmp.ge.s32.totalorder %s2936_s23, 1  ;;  %p200_p8 = scmp.lt.s32.totalorder %s2936_s23, 3 }
   0xe   : > { %p201_p9 = pnand %p2411_p7, %p200_p8 }
   0xf   : > { %s229_s6 = sand.u32 (!%p201_p9), 1, %s2928_s21   ;;  %s232_s7 = smul.u32 (!%p201_p9), 384, %s2998_s4 }
  0x10   : > { %204 = sbr.rel (%p201_p9) target bundleno = 635 (0x27b), region = 40  ;;  %s3061_s26 = sld [smem:[#allocation2]] (!%p201_p9) }
  0x11   : > { %s3039_s12 = smul.u32 (!%p201_p9), 24, %s229_s6  ;;  %p237_p10 = scmp.lt.s32.totalorder (!%p201_p9), %s232_s7, 541 }
  0x12   : > { %s3069_s13 = smov (!%p201_p9), 0  }
  0x13   : > { %s231_s11 = scalar_lea.vmem (!%p201_p9), [#allocation3], %s3039_s12 }
  0x15   : > { %v3030_v0 = vld [vmem:[%s3992_s1] sm:$0xf]  ;;  %v3035_v1 = vld [vmem:[%s3992_s1] sm:$0xf0]  ;;  %v3044_v2 = vld [vmem:[%s3992_s1 + $0x8] sm:$0xf] }
  0x16   : > { %v3049_v3 = vld [vmem:[%s3992_s1 + $0x8] sm:$0xf0]  ;;  %v3054_v4 = vld [vmem:[%s3993_s2] sm:$0x1]  ;;  %s4004_s7 = smov (!%p237_p10, %s232_s7), 541 }
  0x17   : > { %v3059_v5 = vld [vmem:[%s3994_s3] sm:$0x1]  ;;  %s2412_s27 = sshll.u32 %s4004_s7, 2 }
  0x18   : > { %s3066_s10 = scalar_lea.vmem %s3991_s0, %s2412_s27 }
  0x19 LB: >> { %v2678_v6 = vor.u32 %v3049_v3, %v3044_v2  ;;  %v2674_v7 = vor.u32 %v3035_v1, %v3030_v0  ;;  %s2413_s7 = sshll.u32 %s2940_s13, 10  ;;  %vm729_vm0 = vcmask 261120   ;;  %v3147_v40 = vperm.slane %v3054_v4, 0  ;;  %s2743_s17 = sshll.u32 %s2940_s13, 3  ;;  %s2940_s13 = sphi %s3069_s13, %s260_s13  }
  0x1a   : >> { %s262_s14 = sshra.s32 %s2413_s7, 3  ;;  %v3151_v44 = vperm.slane %v3059_v5, 0  ;;  %vm2029_vm1 = vcmask 130112   ;;  %vm2033_vm2 = vcmask 195712   ;;  %vm2037_vm3 = vcmask 261312   ;;  %s2319_s18 = scalar_lea.vmem %s231_s11, %s2743_s17 [#allocation3] }
  0x1b   : >> { %928 = vmatpush.bf16.msra.mxu0 %v2678_v6  ;;  %2815 = vmatpush.bf16.msra.mxu2 %v2678_v6  ;;  %s2414_s15 = sshll.u32 %s262_s14, 2  ;;  %vm2041_vm4 = vcmask 326912   ;;  %vm2045_vm5 = vcmask 392512   ;;  %vm2049_vm6 = vcmask 458112   ;;  %vm2053_vm7 = vcmask 523712   ;;  %s260_s13 = sadd.s32 1, %s2940_s13  }
  0x1c   : >> { %2816 = vmatpush.bf16.msra.mxu3 %v2678_v6  ;;  %2814 = vmatpush.bf16.msra.mxu1 %v2678_v6  ;;  %s3080_s16 = scalar_lea.vmem %s3066_s10, %s2414_s15  ;;  %vm2057_vm8 = vcmask 589312   ;;  %vm2061_vm9 = vcmask 654912   ;;  %vm2065_vm10 = vcmask 720512   ;;  %vm2069_vm11 = vcmask 786112   ;;  %p257_p11 = scmp.ge.s32.totalorder %s260_s13, 3  }
  0x1d   : >> { %v2749_v8 = vld [vmem:[%s3080_s16] sm:$0xff]  ;;  %v2750_v12 = vld [vmem:[%s3080_s16 + $0x8] sm:$0xff]  ;;  %v2751_v16 = vld [vmem:[%s3080_s16 + $0x10] sm:$0xff]  ;;  %vm2073_vm12 = vcmask 851712   ;;  %vm2077_vm13 = vcmask 917312   ;;  %vm2081_vm14 = vcmask 982912  }
  0x1e   : >> { %v2781_v9 = vld [vmem:[%s3080_s16 + $0x100] sm:$0xff]  ;;  %v2782_v13 = vld [vmem:[%s3080_s16 + $0x108] sm:$0xff]  ;;  %v2783_v17 = vld [vmem:[%s3080_s16 + $0x110] sm:$0xff]  ;;  %vm2085_vm15 = vcmask 1048512   ;;  %s2813_s19 = smul.u32 (%p257_p11), 24, %s2998_s4  ;;  %s2334_s24 = sshll.u32 (%p257_p11), %s231_s11, 4  ;;  %s2335_s24 = int_to_ptr.vmem [resolvable:$true] %s2334_s24 }
  0x1f   : >> { %929 = vmatpush.bf16.msra.mxu0 %v2674_v7  ;;  %2818 = vmatpush.bf16.msra.mxu2 %v2674_v7  ;;  %v2797_v10 = vld [vmem:[%s3080_s16 + $0x180] sm:$0xff]  ;;  %v2798_v14 = vld [vmem:[%s3080_s16 + $0x188] sm:$0xff]  ;;  %v2799_v18 = vld [vmem:[%s3080_s16 + $0x190] sm:$0xff]  ;;  %s2322_s14 = scalar_lea.sflag (%p257_p11), [#allocation4], %s229_s6  ;;  %s2890_s12 = scalar_lea.hbm (%p257_p11), %s3996_s5, 48 }
  0x20   : >> { %2819 = vmatpush.bf16.msra.mxu3 %v2674_v7  ;;  %2817 = vmatpush.bf16.msra.mxu1 %v2674_v7  ;;  %v2765_v11 = vld [vmem:[%s3080_s16 + $0x80] sm:$0xff]  ;;  %v2766_v15 = vld [vmem:[%s3080_s16 + $0x88] sm:$0xff]  ;;  %v2767_v19 = vld [vmem:[%s3080_s16 + $0x90] sm:$0xff]  ;;  %s2333_s9 = scalar_lea.hbm (%p257_p11), %s3996_s5, %s2813_s19 }
  0x21   : >> { %v2784_v20 = vld [vmem:[%s3080_s16 + $0x118] sm:$0xff]  ;;  %v2785_v24 = vld [vmem:[%s3080_s16 + $0x120] sm:$0xff]  ;;  %v2754_v28 = vld [vmem:[%s3080_s16 + $0x28] sm:$0xff]  ;;  %s2336_s7 = sshll.u32 (%p257_p11), %s2333_s9, 4  ;;  %s2337_s7 = int_to_ptr.hbm [resolvable:$true] %s2336_s7 }
  0x22   : >> { %2679 = vmatmul.msk.bf16.vlgmr.msra.gmra.mxu0 %vm729_vm0, %v2749_v8  ;;  %2711 = vmatmul.msk.bf16.vlgmr.msra.gmra.mxu2 %vm729_vm0, %v2781_v9  ;;  %v2752_v21 = vld [vmem:[%s3080_s16 + $0x18] sm:$0xff]  ;;  %v2753_v25 = vld [vmem:[%s3080_s16 + $0x20] sm:$0xff]  ;;  %v2786_v29 = vld [vmem:[%s3080_s16 + $0x128] sm:$0xff]  ;;  %s2884_s15 = sshra.s32 (%p257_p11), %s2337_s7, 4  ;;  %s2885_s15 = int_to_ptr.hbm [resolvable:$true] %s2884_s15 }
  0x23   : >> { %2727 = vmatmul.msk.bf16.vlgmr.msra.gmra.mxu3 %vm729_vm0, %v2797_v10  ;;  %2695 = vmatmul.msk.bf16.vlgmr.msra.gmra.mxu1 %vm729_vm0, %v2765_v11  ;;  %v2800_v22 = vld [vmem:[%s3080_s16 + $0x198] sm:$0xff]  ;;  %v2769_v26 = vld [vmem:[%s3080_s16 + $0xa0] sm:$0xff]  ;;  %v2802_v30 = vld [vmem:[%s3080_s16 + $0x1a8] sm:$0xff]  ;;  %s2886_s13 = scalar_lea.hbm (%p257_p11), %s2885_s15, 24  ;;  %p2891_p1 = scmp.lt.s32.totalorder (%p257_p11), %s2885_s15, %s3996_s5 }
  0x24   : >> { %v2768_v23 = vld [vmem:[%s3080_s16 + $0x98] sm:$0xff]  ;;  %v2801_v27 = vld [vmem:[%s3080_s16 + $0x1a0] sm:$0xff]  ;;  %v2770_v31 = vld [vmem:[%s3080_s16 + $0xa8] sm:$0xff]  ;;  %p2887_p12 = scmp.ne.s32.totalorder (%p257_p11), %s2885_s15, %s2886_s13  ;;  %p2892_p2 = scmp.lt.s32.totalorder (%p257_p11), %s2890_s12, %s2886_s13 }
  0x25   : >> { %v2787_v32 = vld [vmem:[%s3080_s16 + $0x130] sm:$0xff]  ;;  %v2788_v36 = vld [vmem:[%s3080_s16 + $0x138] sm:$0xff]  ;;  %v2773_v53 = vld [vmem:[%s3080_s16 + $0xc0] sm:$0xff] }
  0x26   : >> { %v2755_v33 = vld [vmem:[%s3080_s16 + $0x30] sm:$0xff]  ;;  %v2804_v37 = vld [vmem:[%s3080_s16 + $0x1b8] sm:$0xff]  ;;  %v2757_v54 = vld [vmem:[%s3080_s16 + $0x40] sm:$0xff]  ;;  %p2888_p13 = pnand (%p257_p11), %p2887_p12, %p3015_p5  ;;  %p2893_p3 = por (%p257_p11), %p2892_p2, %p2891_p1 }
  0x27   : >> { %v2771_v34 = vld [vmem:[%s3080_s16 + $0xb0] sm:$0xff]  ;;  %v2756_v38 = vld [vmem:[%s3080_s16 + $0x38] sm:$0xff]  ;;  %v2789_v55 = vld [vmem:[%s3080_s16 + $0x140] sm:$0xff] }
  0x28   : >> { %v2803_v35 = vld [vmem:[%s3080_s16 + $0x1b0] sm:$0xff]  ;;  %v2772_v39 = vld [vmem:[%s3080_s16 + $0xb8] sm:$0xff]  ;;  %v2805_v58 = vld [vmem:[%s3080_s16 + $0x1c0] sm:$0xff]  ;;  %p2889_p0 = pneg (%p257_p11), %p2888_p13 }
  0x2a   : > { %p2894_p4 = pnand (%p257_p11), %p2893_p3, %p2889_p0 }
  0x32   : >> { %2680 = vmatmul.msk.bf16.gmra.mxu0 %vm729_vm0, %v2750_v12  ;;  %2712 = vmatmul.msk.bf16.gmra.mxu2 %vm729_vm0, %v2782_v13 }
  0x33   : >> { %2728 = vmatmul.msk.bf16.gmra.mxu3 %vm729_vm0, %v2798_v14  ;;  %2696 = vmatmul.msk.bf16.gmra.mxu1 %vm729_vm0, %v2766_v15 }
  0x42   : >> { %2681 = vmatmul.msk.bf16.gmra.mxu0 %vm729_vm0, %v2751_v16  ;;  %2713 = vmatmul.msk.bf16.gmra.mxu2 %vm729_vm0, %v2783_v17 }
  0x43   : >> { %2729 = vmatmul.msk.bf16.gmra.mxu3 %vm729_vm0, %v2799_v18  ;;  %2697 = vmatmul.msk.bf16.gmra.mxu1 %vm729_vm0, %v2767_v19 }
  0x52   : >> { %2714 = vmatmul.msk.bf16.gmra.mxu2 %vm729_vm0, %v2784_v20  ;;  %2682 = vmatmul.msk.bf16.gmra.mxu0 %vm729_vm0, %v2752_v21 }
  0x53   : >> { %2730 = vmatmul.msk.bf16.gmra.mxu3 %vm729_vm0, %v2800_v22  ;;  %2698 = vmatmul.msk.bf16.gmra.mxu1 %vm729_vm0, %v2768_v23 }
  0x62   : >> { %2715 = vmatmul.msk.bf16.gmra.mxu2 %vm729_vm0, %v2785_v24  ;;  %2683 = vmatmul.msk.bf16.gmra.mxu0 %vm729_vm0, %v2753_v25  ;;  %v2790_v24 = vld [vmem:[%s3080_s16 + $0x148] sm:$0xff] }
  0x63   : >> { %2699 = vmatmul.msk.bf16.gmra.mxu1 %vm729_vm0, %v2769_v26  ;;  %2731 = vmatmul.msk.bf16.gmra.mxu3 %vm729_vm0, %v2801_v27 }
  0x72   : >> { %2684 = vmatmul.msk.bf16.gmra.mxu0 %vm729_vm0, %v2754_v28  ;;  %2716 = vmatmul.msk.bf16.gmra.mxu2 %vm729_vm0, %v2786_v29 }
  0x73   : >> { %2732 = vmatmul.msk.bf16.gmra.mxu3 %vm729_vm0, %v2802_v30  ;;  %2700 = vmatmul.msk.bf16.gmra.mxu1 %vm729_vm0, %v2770_v31 }
  0x82   : >> { %2717 = vmatmul.msk.bf16.gmra.mxu2 %vm729_vm0, %v2787_v32  ;;  %2685 = vmatmul.msk.bf16.gmra.mxu0 %vm729_vm0, %v2755_v33 }
  0x83   : >> { %2701 = vmatmul.msk.bf16.gmra.mxu1 %vm729_vm0, %v2771_v34  ;;  %2733 = vmatmul.msk.bf16.gmra.mxu3 %vm729_vm0, %v2803_v35 }
  0x92   : >> { %2718 = vmatmul.msk.bf16.gmra.mxu2 %vm729_vm0, %v2788_v36  ;;  %2686 = vmatmul.msk.bf16.gmra.mxu0 %vm729_vm0, %v2756_v38 }
  0x93   : >> { %2734 = vmatmul.msk.bf16.gmra.mxu3 %vm729_vm0, %v2804_v37  ;;  %2702 = vmatmul.msk.bf16.gmra.mxu1 %vm729_vm0, %v2772_v39 }
  0x9f   : >> { %v931_v41 = vpop.f32.mrf.mxu0 }
  0xa0   : >> { %v932_v42 = vadd.f32 %v931_v41, %v3147_v40  ;;  %v1011_v43 = vpop.f32.mrf.mxu1  ;;  %v2758_v41 = vld [vmem:[%s3080_s16 + $0x48] sm:$0xff] }
  0xa1   : >> { %v1012_v45 = vadd.f32 %v1011_v43, %v3147_v40  ;;  %v2806_v43 = vld [vmem:[%s3080_s16 + $0x1c8] sm:$0xff] }
  0xa2   : >> { %v1251_v46 = vmax.f32 %v932_v42, 0.0  ;;  %2687 = vmatmul.msk.bf16.gmra.mxu0 %vm729_vm0, %v2757_v54  ;;  %2719 = vmatmul.msk.bf16.gmra.mxu2 %vm729_vm0, %v2789_v55  ;;  %v2774_v42 = vld [vmem:[%s3080_s16 + $0xc8] sm:$0xff] }
  0xa3   : >> { %v1283_v47 = vmax.f32 %v1012_v45, 0.0  ;;  %2703 = vmatmul.msk.bf16.gmra.mxu1 %vm729_vm0, %v2773_v53  ;;  %2735 = vmatmul.msk.bf16.gmra.mxu3 %vm729_vm0, %v2805_v58 }
  0xa4   : >> { %v1382_v48 = vmul.f32 %v3151_v44, %v1251_v46 }
  0xa5   : >> { %v1091_v49 = vpop.f32.mrf.mxu2  ;;  %v1414_v50 = vmul.f32 %v3151_v44, %v1283_v47 }
  0xa6   : >> { %v1092_v51 = vadd.f32 %v1091_v49, %v3147_v40  ;;  %v1171_v52 = vpop.f32.mrf.mxu3  ;;  %1510 = vadd.xlane.f32.xlu0 %v1382_v48 }
  0xa7   : >> { %v1172_v56 = vadd.f32 %v1171_v52, %v3147_v40  ;;  %v933_v57 = vpop.f32.mrf.mxu0  ;;  %1574 = vadd.xlane.f32.xlu2 %v1414_v50 }
  0xa8   : >> { %v1315_v59 = vmax.f32 %v1092_v51, 0.0  ;;  %v1013_v60 = vpop.f32.mrf.mxu1  ;;  %v934_v63 = vadd.f32 %v933_v57, %v3147_v40 }
  0xa9   : >> { %v1347_v61 = vmax.f32 %v1172_v56, 0.0  ;;  %v1014_v19 = vadd.f32 %v1013_v60, %v3147_v40 }
  0xaa   : >> { %v1446_v62 = vmul.f32 %v3151_v44, %v1315_v59  ;;  %v1252_v12 = vmax.f32 %v934_v63, 0.0 }
  0xab   : >> { %v1478_v6 = vmul.f32 %v3151_v44, %v1347_v61  ;;  %v1284_v27 = vmax.f32 %v1014_v19, 0.0 }
  0xac   : >> { %1638 = vadd.xlane.f32.xlu1 %v1446_v62  ;;  %v1383_v20 = vmul.f32 %v3151_v44, %v1252_v12 }
  0xad   : >> { %v1093_v7 = vpop.f32.mrf.mxu2  ;;  %v1415_v35 = vmul.f32 %v3151_v44, %v1284_v27 }
  0xae   : >> { %v1094_v8 = vadd.f32 %v1093_v7, %v3147_v40  ;;  %v1173_v9 = vpop.f32.mrf.mxu3  ;;  %1702 = vadd.xlane.f32.xlu0 %v1478_v6 }
  0xaf   : >> { %v1174_v10 = vadd.f32 %v1173_v9, %v3147_v40  ;;  %v936_v11 = vpop.f32.mrf.mxu0  ;;  %v2775_v9 = vld [vmem:[%s3080_s16 + $0xd0] sm:$0xff] }
  0xb0   : >> { %v1316_v13 = vmax.f32 %v1094_v8, 0.0  ;;  %v1016_v14 = vpop.f32.mrf.mxu1  ;;  %v937_v16 = vadd.f32 %v936_v11, %v3147_v40  ;;  %v2807_v11 = vld [vmem:[%s3080_s16 + $0x1d0] sm:$0xff] }
  0xb1   : >> { %v1348_v15 = vmax.f32 %v1174_v10, 0.0  ;;  %v1017_v29 = vadd.f32 %v1016_v14, %v3147_v40  ;;  %v2791_v10 = vld [vmem:[%s3080_s16 + $0x150] sm:$0xff] }
  0xb2   : >> { %v1447_v17 = vmul.f32 %v3151_v44, %v1316_v13  ;;  %v1253_v21 = vmax.f32 %v937_v16, 0.0  ;;  %2720 = vmatmul.msk.bf16.gmra.mxu2 %vm729_vm0, %v2790_v24  ;;  %2688 = vmatmul.msk.bf16.gmra.mxu0 %vm729_vm0, %v2758_v41 }
  0xb3   : >> { %v1479_v18 = vmul.f32 %v3151_v44, %v1348_v15  ;;  %v1285_v36 = vmax.f32 %v1017_v29, 0.0  ;;  %2704 = vmatmul.msk.bf16.gmra.mxu1 %vm729_vm0, %v2774_v42  ;;  %2736 = vmatmul.msk.bf16.gmra.mxu3 %vm729_vm0, %v2806_v43 }
  0xb4   : >> { %1640 = vadd.xlane.f32.xlu2 %v1447_v17  ;;  %v1384_v32 = vmul.f32 %v3151_v44, %v1253_v21 }
  0xb5   : >> { %1704 = vadd.xlane.f32.xlu1 %v1479_v18  ;;  %v1096_v22 = vpop.f32.mrf.mxu2  ;;  %v1416_v49 = vmul.f32 %v3151_v44, %v1285_v36 }
  0xb6   : >> { %v1176_v23 = vpop.f32.mrf.mxu3  ;;  %1512 = vadd.xlane.f32.xlu0 %v1383_v20  ;;  %v1097_v33 = vadd.f32 %v1096_v22, %v3147_v40 }
  0xb7   : >> { %v1177_v25 = vadd.f32 %v1176_v23, %v3147_v40  ;;  %v938_v26 = vpop.f32.mrf.mxu0  ;;  %v2759_v23 = vld [vmem:[%s3080_s16 + $0x50] sm:$0xff] }
  0xb8   : >> { %v1018_v28 = vpop.f32.mrf.mxu1  ;;  %v1317_v39 = vmax.f32 %v1097_v33, 0.0  ;;  %v939_v51 = vadd.f32 %v938_v26, %v3147_v40 }
  0xb9   : >> { %v1349_v30 = vmax.f32 %v1177_v25, 0.0  ;;  %v1019_v31 = vadd.f32 %v1018_v28, %v3147_v40 }
  0xba   : >> { %v1448_v50 = vmul.f32 %v3151_v44, %v1317_v39  ;;  %v1254_v55 = vmax.f32 %v939_v51, 0.0 }
  0xbb   : >> { %v1480_v34 = vmul.f32 %v3151_v44, %v1349_v30  ;;  %v1286_v37 = vmax.f32 %v1019_v31, 0.0 }
  0xbc   : >> { %v1385_v62 = vmul.f32 %v3151_v44, %v1254_v55 }
  0xbd   : >> { %1706 = vadd.xlane.f32.xlu2 %v1480_v34  ;;  %1514 = vadd.xlane.f32.xlu1 %v1384_v32  ;;  %v1098_v38 = vpop.f32.mrf.mxu2  ;;  %v1417_v47 = vmul.f32 %v3151_v44, %v1286_v37 }
  0xbe   : >> { %1576 = vadd.xlane.f32.xlu0 %v1415_v35  ;;  %v1178_v46 = vpop.f32.mrf.mxu3  ;;  %v1099_v61 = vadd.f32 %v1098_v38, %v3147_v40 }
  0xbf   : >> { %v941_v45 = vpop.f32.mrf.mxu0  ;;  %v1179_v52 = vadd.f32 %v1178_v46, %v3147_v40 }
  0xc0   : >> { %v942_v48 = vadd.f32 %v941_v45, %v3147_v40  ;;  %v1021_v57 = vpop.f32.mrf.mxu1  ;;  %v1318_v12 = vmax.f32 %v1099_v61, 0.0 }
  0xc1   : >> { %v1350_v56 = vmax.f32 %v1179_v52, 0.0  ;;  %v1022_v60 = vadd.f32 %v1021_v57, %v3147_v40  ;;  %v2776_v52 = vld [vmem:[%s3080_s16 + $0xd8] sm:$0xff] }
  0xc2   : >> { %v1255_v53 = vmax.f32 %v942_v48, 0.0  ;;  %2721 = vmatmul.msk.bf16.gmra.mxu2 %vm729_vm0, %v2791_v10  ;;  %v1449_v19 = vmul.f32 %v3151_v44, %v1318_v12  ;;  %2689 = vmatmul.msk.bf16.gmra.mxu0 %vm729_vm0, %v2759_v23  ;;  %v2808_v57 = vld [vmem:[%s3080_s16 + $0x1d8] sm:$0xff] }
  0xc3   : >> { %v1481_v63 = vmul.f32 %v3151_v44, %v1350_v56  ;;  %v1287_v7 = vmax.f32 %v1022_v60, 0.0  ;;  %2705 = vmatmul.msk.bf16.gmra.mxu1 %vm729_vm0, %v2775_v9  ;;  %2737 = vmatmul.msk.bf16.gmra.mxu3 %vm729_vm0, %v2807_v11 }
  0xc4   : >> { %v1386_v59 = vmul.f32 %v3151_v44, %v1255_v53  ;;  %v2760_v53 = vld [vmem:[%s3080_s16 + $0x58] sm:$0xff] }
  0xc5   : >> { %1580 = vadd.xlane.f32.xlu2 %v1417_v47  ;;  %1578 = vadd.xlane.f32.xlu1 %v1416_v49  ;;  %v1101_v54 = vpop.f32.mrf.mxu2  ;;  %v1418_v17 = vmul.f32 %v3151_v44, %v1287_v7 }
  0xc6   : >> { %1642 = vadd.xlane.f32.xlu0 %v1448_v50  ;;  %v1102_v58 = vadd.f32 %v1101_v54, %v3147_v40  ;;  %v1181_v8 = vpop.f32.mrf.mxu3  ;;  %v2792_v54 = vld [vmem:[%s3080_s16 + $0x158] sm:$0xff] }
  0xc7   : >> { %v943_v13 = vpop.f32.mrf.mxu0  ;;  %v1182_v14 = vadd.f32 %v1181_v8, %v3147_v40 }
  0xc8   : >> { %v1319_v6 = vmax.f32 %v1102_v58, 0.0  ;;  %v944_v18 = vadd.f32 %v943_v13, %v3147_v40  ;;  %v1023_v22 = vpop.f32.mrf.mxu1 }
  0xc9   : >> { %v1351_v21 = vmax.f32 %v1182_v14, 0.0  ;;  %v1024_v30 = vadd.f32 %v1023_v22, %v3147_v40 }
  0xca   : >> { %v1450_v16 = vmul.f32 %v3151_v44, %v1319_v6  ;;  %v1256_v24 = vmax.f32 %v944_v18, 0.0 }
  0xcb   : >> { %v1482_v28 = vmul.f32 %v3151_v44, %v1351_v21  ;;  %v1288_v37 = vmax.f32 %v1024_v30, 0.0 }
  0xcc   : >> { %v1387_v32 = vmul.f32 %v3151_v44, %v1256_v24 }
  0xcd   : >> { %1518 = vadd.xlane.f32.xlu2 %v1386_v59  ;;  %1516 = vadd.xlane.f32.xlu1 %v1385_v62  ;;  %v1103_v15 = vpop.f32.mrf.mxu2  ;;  %v1419_v47 = vmul.f32 %v3151_v44, %v1288_v37 }
  0xce   : >> { %1708 = vadd.xlane.f32.xlu0 %v1481_v63  ;;  %v1104_v20 = vadd.f32 %v1103_v15, %v3147_v40  ;;  %v1183_v26 = vpop.f32.mrf.mxu3 }
  0xcf   : >> { %v946_v27 = vpop.f32.mrf.mxu0  ;;  %v1184_v31 = vadd.f32 %v1183_v26, %v3147_v40 }
  0xd0   : >> { %v1320_v25 = vmax.f32 %v1104_v20, 0.0  ;;  %v947_v29 = vadd.f32 %v946_v27, %v3147_v40  ;;  %v1026_v35 = vpop.f32.mrf.mxu1 }
  0xd1   : >> { %v1352_v38 = vmax.f32 %v1184_v31, 0.0  ;;  %v1027_v41 = vadd.f32 %v1026_v35, %v3147_v40  ;;  %v2777_v35 = vld [vmem:[%s3080_s16 + $0xe0] sm:$0xff] }
  0xd2   : >> { %v1451_v33 = vmul.f32 %v3151_v44, %v1320_v25  ;;  %v1257_v36 = vmax.f32 %v947_v29, 0.0  ;;  %2690 = vmatmul.msk.bf16.gmra.mxu0 %vm729_vm0, %v2760_v53  ;;  %2722 = vmatmul.msk.bf16.gmra.mxu2 %vm729_vm0, %v2792_v54 }
  0xd3   : >> { %v1483_v46 = vmul.f32 %v3151_v44, %v1352_v38  ;;  %v1289_v49 = vmax.f32 %v1027_v41, 0.0  ;;  %2706 = vmatmul.msk.bf16.gmra.mxu1 %vm729_vm0, %v2776_v52  ;;  %2738 = vmatmul.msk.bf16.gmra.mxu3 %vm729_vm0, %v2808_v57  ;;  %v2809_v38 = vld [vmem:[%s3080_s16 + $0x1e0] sm:$0xff] }
  0xd4   : >> { %v1388_v45 = vmul.f32 %v3151_v44, %v1257_v36  ;;  %v2761_v36 = vld [vmem:[%s3080_s16 + $0x60] sm:$0xff] }
  0xd5   : >> { %1646 = vadd.xlane.f32.xlu2 %v1450_v16  ;;  %1644 = vadd.xlane.f32.xlu1 %v1449_v19  ;;  %v1106_v34 = vpop.f32.mrf.mxu2  ;;  %v1420_v58 = vmul.f32 %v3151_v44, %v1289_v49 }
  0xd6   : >> { %1582 = vadd.xlane.f32.xlu0 %v1418_v17  ;;  %v1107_v39 = vadd.f32 %v1106_v34, %v3147_v40  ;;  %v1186_v42 = vpop.f32.mrf.mxu3 }
  0xd7   : >> { %v1187_v43 = vadd.f32 %v1186_v42, %v3147_v40  ;;  %v948_v50 = vpop.f32.mrf.mxu0 }
  0xd8   : >> { %v1321_v48 = vmax.f32 %v1107_v39, 0.0  ;;  %v1028_v56 = vpop.f32.mrf.mxu1  ;;  %v949_v61 = vadd.f32 %v948_v50, %v3147_v40 }
  0xd9   : >> { %v1353_v51 = vmax.f32 %v1187_v43, 0.0  ;;  %v1029_v63 = vadd.f32 %v1028_v56, %v3147_v40 }
  0xda   : >> { %v1452_v59 = vmul.f32 %v3151_v44, %v1321_v48  ;;  %v1258_v8 = vmax.f32 %v949_v61, 0.0 }
  0xdb   : >> { %v1484_v60 = vmul.f32 %v3151_v44, %v1353_v51  ;;  %v1290_v11 = vmax.f32 %v1029_v63, 0.0 }
  0xdc   : >> { %v1389_v17 = vmul.f32 %v3151_v44, %v1258_v8  ;;  %v2778_v8 = vld [vmem:[%s3080_s16 + $0xe8] sm:$0xff] }
  0xdd   : >> { %1520 = vadd.xlane.f32.xlu2 %v1387_v32  ;;  %1710 = vadd.xlane.f32.xlu1 %v1482_v28  ;;  %v1108_v55 = vpop.f32.mrf.mxu2  ;;  %v1421_v18 = vmul.f32 %v3151_v44, %v1290_v11  ;;  %v2793_v28 = vld [vmem:[%s3080_s16 + $0x160] sm:$0xff] }
  0xde   : >> { %1648 = vadd.xlane.f32.xlu0 %v1451_v33  ;;  %v1109_v62 = vadd.f32 %v1108_v55, %v3147_v40  ;;  %v1188_v6 = vpop.f32.mrf.mxu3 }
  0xdf   : >> { %v951_v7 = vpop.f32.mrf.mxu0  ;;  %v1189_v15 = vadd.f32 %v1188_v6, %v3147_v40 }
  0xe0   : >> { %v1322_v9 = vmax.f32 %v1109_v62, 0.0  ;;  %v952_v12 = vadd.f32 %v951_v7, %v3147_v40  ;;  %v1031_v13 = vpop.f32.mrf.mxu1 }
  0xe1   : >> { %v1354_v22 = vmax.f32 %v1189_v15, 0.0  ;;  %v1032_v23 = vadd.f32 %v1031_v13, %v3147_v40 }
  0xe2   : >> { %v1453_v16 = vmul.f32 %v3151_v44, %v1322_v9  ;;  %v1259_v19 = vmax.f32 %v952_v12, 0.0  ;;  %2723 = vmatmul.msk.bf16.gmra.mxu2 %vm729_vm0, %v2793_v28  ;;  %2691 = vmatmul.msk.bf16.gmra.mxu0 %vm729_vm0, %v2761_v36 }
  0xe3   : >> { %v1485_v30 = vmul.f32 %v3151_v44, %v1354_v22  ;;  %v1291_v33 = vmax.f32 %v1032_v23, 0.0  ;;  %2707 = vmatmul.msk.bf16.gmra.mxu1 %vm729_vm0, %v2777_v35  ;;  %2739 = vmatmul.msk.bf16.gmra.mxu3 %vm729_vm0, %v2809_v38 }
  0xe4   : >> { %v1390_v27 = vmul.f32 %v3151_v44, %v1259_v19 }
  0xe5   : >> { %1712 = vadd.xlane.f32.xlu2 %v1483_v46  ;;  %1584 = vadd.xlane.f32.xlu1 %v1419_v47  ;;  %v1111_v10 = vpop.f32.mrf.mxu2  ;;  %v1422_v42 = vmul.f32 %v3151_v44, %v1291_v33 }
  0xe6   : >> { %1522 = vadd.xlane.f32.xlu0 %v1388_v45  ;;  %v1112_v14 = vadd.f32 %v1111_v10, %v3147_v40  ;;  %v1191_v21 = vpop.f32.mrf.mxu3  ;;  %v2794_v10 = vld [vmem:[%s3080_s16 + $0x168] sm:$0xff] }
  0xe7   : >> { %v953_v24 = vpop.f32.mrf.mxu0  ;;  %v1192_v26 = vadd.f32 %v1191_v21, %v3147_v40  ;;  %v2762_v21 = vld [vmem:[%s3080_s16 + $0x68] sm:$0xff] }
  0xe8   : >> { %v1323_v20 = vmax.f32 %v1112_v14, 0.0  ;;  %v1033_v31 = vpop.f32.mrf.mxu1  ;;  %v954_v32 = vadd.f32 %v953_v24, %v3147_v40  ;;  %v2810_v14 = vld [vmem:[%s3080_s16 + $0x1e8] sm:$0xff] }
  0xe9   : >> { %v1355_v34 = vmax.f32 %v1192_v26, 0.0  ;;  %v1034_v46 = vadd.f32 %v1033_v31, %v3147_v40 }
  0xea   : >> { %v1454_v29 = vmul.f32 %v3151_v44, %v1323_v20  ;;  %v1260_v37 = vmax.f32 %v954_v32, 0.0 }
  0xeb   : >> { %v1486_v41 = vmul.f32 %v3151_v44, %v1355_v34  ;;  %v1292_v52 = vmax.f32 %v1034_v46, 0.0 }
  0xec   : >> { %v1391_v49 = vmul.f32 %v3151_v44, %v1260_v37 }
  0xed   : >> { %1586 = vadd.xlane.f32.xlu2 %v1420_v58  ;;  %1650 = vadd.xlane.f32.xlu1 %v1452_v59  ;;  %v1113_v25 = vpop.f32.mrf.mxu2  ;;  %v1423_v57 = vmul.f32 %v3151_v44, %v1292_v52 }
  0xee   : >> { %1714 = vadd.xlane.f32.xlu0 %v1484_v60  ;;  %v1193_v39 = vpop.f32.mrf.mxu3  ;;  %v1114_v45 = vadd.f32 %v1113_v25, %v3147_v40 }
  0xef   : >> { %v1194_v48 = vadd.f32 %v1193_v39, %v3147_v40  ;;  %v956_v50 = vpop.f32.mrf.mxu0 }
  0xf0   : >> { %v1036_v47 = vpop.f32.mrf.mxu1  ;;  %v1324_v51 = vmax.f32 %v1114_v45, 0.0  ;;  %v957_v54 = vadd.f32 %v956_v50, %v3147_v40 }
  0xf1   : >> { %v1356_v53 = vmax.f32 %v1194_v48, 0.0  ;;  %v1037_v56 = vadd.f32 %v1036_v47, %v3147_v40 }
  0xf2   : >> { %v1455_v58 = vmul.f32 %v3151_v44, %v1324_v51  ;;  %v1261_v62 = vmax.f32 %v957_v54, 0.0  ;;  %2724 = vmatmul.msk.bf16.gmra.mxu2 %vm729_vm0, %v2794_v10  ;;  %2692 = vmatmul.msk.bf16.gmra.mxu0 %vm729_vm0, %v2762_v21 }
  0xf3   : >> { %v1487_v61 = vmul.f32 %v3151_v44, %v1356_v53  ;;  %v1293_v7 = vmax.f32 %v1037_v56, 0.0  ;;  %2708 = vmatmul.msk.bf16.gmra.mxu1 %vm729_vm0, %v2778_v8  ;;  %2740 = vmatmul.msk.bf16.gmra.mxu3 %vm729_vm0, %v2810_v14 }
  0xf4   : >> { %v1392_v13 = vmul.f32 %v3151_v44, %v1261_v62  ;;  %v2763_v62 = vld [vmem:[%s3080_s16 + $0x70] sm:$0xff] }
  0xf5   : >> { %1652 = vadd.xlane.f32.xlu2 %v1453_v16  ;;  %1524 = vadd.xlane.f32.xlu1 %v1389_v17  ;;  %v1116_v43 = vpop.f32.mrf.mxu2  ;;  %v1424_v15 = vmul.f32 %v3151_v44, %v1293_v7 }
  0xf6   : >> { %1588 = vadd.xlane.f32.xlu0 %v1421_v18  ;;  %v1117_v55 = vadd.f32 %v1116_v43, %v3147_v40  ;;  %v1196_v59 = vpop.f32.mrf.mxu3 }
  0xf7   : >> { %v958_v9 = vpop.f32.mrf.mxu0  ;;  %v1197_v11 = vadd.f32 %v1196_v59, %v3147_v40 }
  0xf8   : >> { %v1325_v63 = vmax.f32 %v1117_v55, 0.0  ;;  %v1038_v6 = vpop.f32.mrf.mxu1  ;;  %v959_v16 = vadd.f32 %v958_v9, %v3147_v40 }
  0xf9   : >> { %v1357_v18 = vmax.f32 %v1197_v11, 0.0  ;;  %v2811_v11 = vld [vmem:[%s3080_s16 + $0x1f0] sm:$0xff] }
  0xfa   : >> { %v1456_v12 = vmul.f32 %v3151_v44, %v1325_v63  ;;  %v1262_v22 = vmax.f32 %v959_v16, 0.0  ;;  %v2779_v63 = vld [vmem:[%s3080_s16 + $0xf0] sm:$0xff] }
  0xfc   : >> { %v1393_v31 = vmul.f32 %v3151_v44, %v1262_v22 }
  0xfd   : >> { %1526 = vadd.xlane.f32.xlu2 %v1390_v27  ;;  %1716 = vadd.xlane.f32.xlu1 %v1485_v30  ;;  %v1118_v60 = vpop.f32.mrf.mxu2  ;;  %v1488_v27 = vmul.f32 %v3151_v44, %v1357_v18 }
  0xfe   : >> { %1654 = vadd.xlane.f32.xlu0 %v1454_v29  ;;  %v1119_v17 = vadd.f32 %v1118_v60, %v3147_v40  ;;  %v1198_v19 = vpop.f32.mrf.mxu3  ;;  %v1039_v29 = vadd.f32 %v1038_v6, %v3147_v40 }
  0xff   : >> { %v961_v26 = vpop.f32.mrf.mxu0  ;;  %v1199_v30 = vadd.f32 %v1198_v19, %v3147_v40 }
 0x100   : >> { %v1041_v23 = vpop.f32.mrf.mxu1  ;;  %v1326_v24 = vmax.f32 %v1119_v17, 0.0  ;;  %v962_v28 = vadd.f32 %v961_v26, %v3147_v40  ;;  %v1294_v36 = vmax.f32 %v1039_v29, 0.0 }
 0x101   : >> { %v1358_v37 = vmax.f32 %v1199_v30, 0.0  ;;  %v1042_v43 = vadd.f32 %v1041_v23, %v3147_v40 }
 0x102   : >> { %v1457_v32 = vmul.f32 %v3151_v44, %v1326_v24  ;;  %v1263_v35 = vmax.f32 %v962_v28, 0.0  ;;  %v1425_v51 = vmul.f32 %v3151_v44, %v1294_v36  ;;  %2693 = vmatmul.msk.bf16.gmra.mxu0 %vm729_vm0, %v2763_v62 }
 0x103   : >> { %v1489_v50 = vmul.f32 %v3151_v44, %v1358_v37  ;;  %v1295_v54 = vmax.f32 %v1042_v43, 0.0  ;;  %2709 = vmatmul.msk.bf16.gmra.mxu1 %vm729_vm0, %v2779_v63  ;;  %2741 = vmatmul.msk.bf16.gmra.mxu3 %vm729_vm0, %v2811_v11  ;;  %v2796_v11 = vld [vmem:[%s3080_s16 + $0x178] sm:$0xff] }
 0x104   : >> { %v1394_v48 = vmul.f32 %v3151_v44, %v1263_v35 }
 0x105   : >> { %1718 = vadd.xlane.f32.xlu2 %v1486_v41  ;;  %1590 = vadd.xlane.f32.xlu1 %v1422_v42  ;;  %v1121_v20 = vpop.f32.mrf.mxu2  ;;  %v2024_v41 = vlaneseq  ;;  %v2795_v42 = vld [vmem:[%s3080_s16 + $0x170] sm:$0xff] }
 0x106   : >> { %1528 = vadd.xlane.f32.xlu0 %v1391_v49  ;;  %v1201_v34 = vpop.f32.mrf.mxu3  ;;  %v1122_v45 = vadd.f32 %v1121_v20, %v3147_v40  ;;  %2725 = vmatmul.msk.bf16.gmra.mxu2 %vm729_vm0, %v2795_v42  ;;  %v3305_v49 = vstv %s3061_s26 }
 0x107   : >> { %v3309_v52 = vand.u32 127, %v2024_v41  ;;  %v1202_v8 = vadd.f32 %v1201_v34, %v3147_v40 }
 0x108   : >> { %v1043_v47 = vpop.f32.mrf.mxu1  ;;  %v1327_v55 = vmax.f32 %v1122_v45, 0.0 }
 0x109   : >> { %v1044_v53 = vadd.f32 %v1043_v47, %v3147_v40  ;;  %v1359_v28 = vmax.f32 %v1202_v8, 0.0  ;;  %v3345_v35 = vadd.s32 4294967280, %v3309_v52 }
 0x10a   : >> { %v1458_v16 = vmul.f32 %v3151_v44, %v1327_v55 }
 0x10b   : >> { %v1296_v7 = vmax.f32 %v1044_v53, 0.0 }
 0x10d   : >> { %1592 = vadd.xlane.f32.xlu2 %v1423_v57  ;;  %1656 = vadd.xlane.f32.xlu1 %v1455_v58  ;;  %v3297_v39 = vpop.f32.mrf.mxu2  ;;  %v963_v57 = vpop.f32.mrf.mxu0  ;;  %v3314_v58 = vadd.s32 4294967288, %v3309_v52 }
 0x10e   : >> { %1720 = vadd.xlane.f32.xlu0 %v1487_v61  ;;  %v1203_v61 = vpop.f32.mrf.mxu3  ;;  %v964_v22 = vadd.f32 %v963_v57, %v3147_v40  ;;  %v1124_v42 = vadd.f32 %v3297_v39, %v3147_v40 }
 0x10f   : >> { %v1204_v53 = vadd.f32 %v1203_v61, %v3147_v40 }
 0x110   : >> { %v1046_v30 = vpop.f32.mrf.mxu1  ;;  %v1264_v34 = vmax.f32 %v964_v22, 0.0  ;;  %v1328_v61 = vmax.f32 %v1124_v42, 0.0 }
 0x112   : >> { %v1395_v55 = vmul.f32 %v3151_v44, %v1264_v34  ;;  %v2764_v34 = vld [vmem:[%s3080_s16 + $0x78] sm:$0xff] }
 0x113   : >> { %2694 = vmatmul.msk.bf16.gmra.mxu0 %vm729_vm0, %v2764_v34 }
 0x115   : >> { %1658 = vadd.xlane.f32.xlu2 %v1456_v12  ;;  %1530 = vadd.xlane.f32.xlu1 %v1392_v13  ;;  %v1126_v14 = vpop.f32.mrf.mxu2  ;;  %v966_v36 = vpop.f32.mrf.mxu0 }
 0x116   : >> { %1594 = vadd.xlane.f32.xlu0 %v1424_v15  ;;  %v1426_v15 = vmul.f32 %v3151_v44, %v1295_v54  ;;  %v1127_v20 = vadd.f32 %v1126_v14, %v3147_v40  ;;  %v1206_v47 = vpop.f32.mrf.mxu3  ;;  %2726 = vmatmul.msk.bf16.gmra.mxu2 %vm729_vm0, %v2796_v11 }
 0x118   : >> { %v1048_v8 = vpop.f32.mrf.mxu1 }
 0x119   : >> { %v1511_v25 = vpop.xlane.xlu0 %1510 }
 0x11a   : >> { %v3295_v33 = vpop.xlane.xlu2 %1574  ;;  %v1767_v6 = vadd.f32 %v3305_v49, %v1511_v25 }
 0x11b   : >> { %v1799_v37 = vadd.f32 %v3305_v49, %v3295_v33 }
 0x11c   : >> { %v2026_v24 = vperm.slane %v1767_v6, %v3309_v52  ;;  %v1360_v6 = vmax.f32 %v1204_v53, 0.0 }
 0x11d   : >> { %1532 = vadd.xlane.f32.xlu2 %v1393_v31  ;;  %1722 = vadd.xlane.f32.xlu1 %v1488_v27  ;;  %v1427_v27 = vmul.f32 %v3151_v44, %v1296_v7  ;;  %v3371_v7 = vadd.s32 4294967272, %v3309_v52 }
 0x11e   : >> { %1660 = vadd.xlane.f32.xlu0 %v1457_v32  ;;  %v1329_v32 = vmax.f32 %v1127_v20, 0.0 }
 0x11f   : >> { %v1639_v38 = vpop.xlane.xlu1 %1638 }
 0x120   : >> { %v1831_v56 = vadd.f32 %v3305_v49, %v1639_v38  ;;  %v1460_v33 = vmul.f32 %v3151_v44, %v1329_v32 }
 0x121   : >> { %v1703_v46 = vpop.xlane.xlu0 %1702 }
 0x122   : >> { %v1863_v59 = vadd.f32 %v3305_v49, %v1703_v46  ;;  %v2180_v17 = vperm.slane %v1831_v56, %v3309_v52  ;;  %v2118_v56 = vperm.slane %v1799_v37, %v3309_v52  ;;  %v3393_v37 = vpop.f32.mrf.mxu3 }
 0x124   : >> { %v2242_v21 = vperm.slane %v1863_v59, %v3309_v52 }
 0x125   : >> { %1724 = vadd.xlane.f32.xlu2 %v1489_v50  ;;  %1596 = vadd.xlane.f32.xlu1 %v1425_v51  ;;  %v1207_v51 = vadd.f32 %v1206_v47, %v3147_v40  ;;  %v1051_v47 = vpop.f32.mrf.mxu1 }
 0x126   : >> { %1534 = vadd.xlane.f32.xlu0 %v1394_v48  ;;  %v1490_v48 = vmul.f32 %v3151_v44, %v1359_v28 }
 0x127   : >> { %v1641_v60 = vpop.xlane.xlu2 %1640  ;;  %v1361_v63 = vmax.f32 %v1207_v51, 0.0  ;;  %v2812_v51 = vld [vmem:[%s3080_s16 + $0x1f8] sm:$0xff] }
 0x128   : >> { %v1705_v9 = vpop.xlane.xlu1 %1704  ;;  %v1832_v10 = vadd.f32 %v3305_v49, %v1641_v60  ;;  %2742 = vmatmul.msk.bf16.gmra.mxu3 %vm729_vm0, %v2812_v51 }
 0x129   : >> { %v1864_v12 = vadd.f32 %v3305_v49, %v1705_v9  ;;  %v1513_v13 = vpop.xlane.xlu0 %1512  ;;  %v1492_v20 = vmul.f32 %v3151_v44, %v1361_v63 }
 0x12a   : >> { %v2181_v18 = vperm.slane %v1832_v10, %v3314_v58  ;;  %v1768_v19 = vadd.f32 %v3305_v49, %v1513_v13  ;;  %v1047_v13 = vadd.f32 %v1046_v30, %v3147_v40  ;;  %v1128_v30 = vpop.f32.mrf.mxu2 }
 0x12b   : >> { %v2243_v23 = vperm.slane %v1864_v12, %v3314_v58  ;;  %v967_v12 = vadd.f32 %v966_v36, %v3147_v40  ;;  %v2780_v36 = vld [vmem:[%s3080_s16 + $0xf8] sm:$0xff] }
 0x12c   : >> { %v3338_v25 = vsel %vm2029_vm1, %v2181_v18, %v2180_v17  ;;  %v2028_v26 = vperm.slane %v1768_v19, %v3314_v58  ;;  %v968_v17 = vpop.f32.mrf.mxu0  ;;  %v1459_v19 = vmul.f32 %v3151_v44, %v1328_v61  ;;  %v1297_v28 = vmax.f32 %v1047_v13, 0.0  ;;  %2710 = vmatmul.msk.bf16.gmra.mxu1 %vm729_vm0, %v2780_v36 }
 0x12d   : >> { %v2244_v29 = vsel %vm2029_vm1, %v2243_v23, %v2242_v21  ;;  %1598 = vadd.xlane.f32.xlu2 %v1426_v15  ;;  %1662 = vadd.xlane.f32.xlu1 %v1458_v16  ;;  %v1491_v23 = vmul.f32 %v3151_v44, %v1360_v6  ;;  %vm2304_vm0 = vcmask 1041409  }
 0x12e   : >> { %v2030_v31 = vsel %vm2029_vm1, %v2028_v26, %v2026_v24  ;;  %1600 = vadd.xlane.f32.xlu0 %v1427_v27  ;;  %v969_v26 = vadd.f32 %v968_v17, %v3147_v40  ;;  %v1265_v27 = vmax.f32 %v967_v12, 0.0 }
 0x130   : >> { %v1707_v38 = vpop.xlane.xlu2 %1706  ;;  %v1515_v41 = vpop.xlane.xlu1 %1514 }
 0x131   : >> { %v1865_v43 = vadd.f32 %v3305_v49, %v1707_v38  ;;  %v1769_v45 = vadd.f32 %v3305_v49, %v1515_v41  ;;  %v1577_v46 = vpop.xlane.xlu0 %1576  ;;  %v3396_v38 = vadd.s32 4294967264, %v3309_v52  ;;  %v1266_v41 = vmax.f32 %v969_v26, 0.0 }
 0x132   : >> { %v1800_v50 = vadd.f32 %v3305_v49, %v1577_v46 }
 0x133   : >> { %v2245_v54 = vperm.slane %v1865_v43, %v3345_v35  ;;  %v2032_v39 = vperm.slane %v1769_v45, %v3345_v35  ;;  %v1397_v61 = vmul.f32 %v3151_v44, %v1266_v41 }
 0x134   : >> { %v2119_v57 = vperm.slane %v1800_v50, %v3314_v58  ;;  %v1428_v50 = vmul.f32 %v3151_v44, %v1297_v28  ;;  %v971_v63 = vpop.f32.mrf.mxu0 }
 0x135   : >> { %v3364_v59 = vsel %vm2033_vm2, %v2245_v54, %v2244_v29  ;;  %v3367_v60 = vsel %vm2033_vm2, %v2032_v39, %v2030_v31  ;;  %1726 = vadd.xlane.f32.xlu2 %v1490_v48  ;;  %1536 = vadd.xlane.f32.xlu1 %v1395_v55  ;;  %v1396_v48 = vmul.f32 %v3151_v44, %v1265_v27 }
 0x136   : >> { %v2120_v62 = vsel %vm2029_vm1, %v2119_v57, %v2118_v56  ;;  %1666 = vadd.xlane.f32.xlu0 %v1460_v33  ;;  %v1129_v33 = vadd.f32 %v1128_v30, %v3147_v40  ;;  %v1052_v54 = vadd.f32 %v1051_v47, %v3147_v40  ;;  %v1049_v39 = vadd.f32 %v1048_v8, %v3147_v40  ;;  %v1053_v30 = vpop.f32.mrf.mxu1 }
 0x138   : >> { %v1581_v9 = vpop.xlane.xlu2 %1580  ;;  %v1579_v10 = vpop.xlane.xlu1 %1578  ;;  %v1299_v8 = vmax.f32 %v1052_v54, 0.0  ;;  %v1330_v11 = vmax.f32 %v1129_v33, 0.0  ;;  %v1298_v12 = vmax.f32 %v1049_v39, 0.0 }
 0x139   : >> { %v1802_v14 = vadd.f32 %v3305_v49, %v1581_v9  ;;  %v1801_v15 = vadd.f32 %v3305_v49, %v1579_v10  ;;  %v1643_v16 = vpop.xlane.xlu0 %1642  ;;  %v1131_v9 = vpop.f32.mrf.mxu2 }
 0x13a   : >> { %v1833_v18 = vadd.f32 %v3305_v49, %v1643_v16  ;;  %v1461_v26 = vmul.f32 %v3151_v44, %v1330_v11 }
 0x13b   : >> { %v2123_v21 = vperm.slane %v1802_v14, %v3371_v7  ;;  %v2121_v22 = vperm.slane %v1801_v15, %v3345_v35  ;;  %v972_v15 = vadd.f32 %v971_v63, %v3147_v40 }
 0x13c   : >> { %v2183_v24 = vperm.slane %v1833_v18, %v3345_v35  ;;  %v1132_v18 = vadd.f32 %v1131_v9, %v3147_v40 }
 0x13d   : >> { %v2122_v29 = vsel %vm2033_vm2, %v2121_v22, %v2120_v62  ;;  %1664 = vadd.xlane.f32.xlu2 %v1459_v19  ;;  %1728 = vadd.xlane.f32.xlu1 %v1491_v23  ;;  %v1211_v19 = vpop.f32.mrf.mxu3  ;;  %v1267_v28 = vmax.f32 %v972_v15, 0.0 }
 0x13e   : >> { %v2184_v31 = vsel %vm2033_vm2, %v2183_v24, %v3338_v25  ;;  %1730 = vadd.xlane.f32.xlu0 %v1492_v20  ;;  %v2124_v32 = vsel %vm2037_vm3, %v2123_v21, %v2122_v29  ;;  %v1212_v20 = vadd.f32 %v1211_v19, %v3147_v40  ;;  %v1430_v21 = vmul.f32 %v3151_v44, %v1299_v8 }
 0x13f   : >> { %v1429_v24 = vmul.f32 %v3151_v44, %v1298_v12  ;;  %v1331_v34 = vmax.f32 %v1132_v18, 0.0  ;;  %v1398_v33 = vmul.f32 %v3151_v44, %v1267_v28 }
 0x140   : >> { %v1519_v42 = vpop.xlane.xlu2 %1518  ;;  %v1517_v43 = vpop.xlane.xlu1 %1516  ;;  %v1363_v41 = vmax.f32 %v1212_v20, 0.0 }
 0x141   : >> { %v1771_v25 = vadd.f32 %v3305_v49, %v1519_v42  ;;  %v1770_v45 = vadd.f32 %v3305_v49, %v1517_v43  ;;  %v1709_v46 = vpop.xlane.xlu0 %1708  ;;  %v973_v43 = vpop.f32.mrf.mxu0 }
 0x142   : >> { %v1866_v53 = vadd.f32 %v3305_v49, %v1709_v46  ;;  %v1133_v51 = vpop.f32.mrf.mxu2  ;;  %v1494_v39 = vmul.f32 %v3151_v44, %v1363_v41 }
 0x143   : >> { %v2040_v55 = vperm.slane %v1771_v25, %v3396_v38  ;;  %v2036_v56 = vperm.slane %v1770_v45, %v3371_v7  ;;  %v3435_v25 = vadd.s32 4294967256, %v3309_v52  ;;  %v1054_v45 = vadd.f32 %v1053_v30, %v3147_v40 }
 0x144   : >> { %v2247_v57 = vperm.slane %v1866_v53, %v3371_v7  ;;  %v974_v53 = vadd.f32 %v973_v43, %v3147_v40 }
 0x145   : >> { %v2038_v62 = vsel %vm2037_vm3, %v2036_v56, %v3367_v60  ;;  %1538 = vadd.xlane.f32.xlu2 %v1396_v48  ;;  %1602 = vadd.xlane.f32.xlu1 %v1428_v50  ;;  %v1300_v8 = vmax.f32 %v1054_v45, 0.0  ;;  %v1213_v12 = vpop.f32.mrf.mxu3 }
 0x146   : >> { %v2248_v6 = vsel %vm2037_vm3, %v2247_v57, %v3364_v59  ;;  %1540 = vadd.xlane.f32.xlu0 %v1397_v61  ;;  %v2042_v10 = vsel %vm2041_vm4, %v2040_v55, %v2038_v62  ;;  %v1134_v61 = vadd.f32 %v1133_v51, %v3147_v40  ;;  %v1268_v9 = vmax.f32 %v974_v53, 0.0 }
 0x148   : >> { %v1647_v13 = vpop.xlane.xlu2 %1646  ;;  %v1645_v14 = vpop.xlane.xlu1 %1644 }
 0x149   : >> { %v1835_v16 = vadd.f32 %v3305_v49, %v1647_v13  ;;  %v1834_v60 = vadd.f32 %v3305_v49, %v1645_v14  ;;  %v1583_v17 = vpop.xlane.xlu0 %1582  ;;  %v1056_v13 = vpop.f32.mrf.mxu1  ;;  %v1332_v14 = vmax.f32 %v1134_v61, 0.0 }
 0x14a   : >> { %v1803_v59 = vadd.f32 %v3305_v49, %v1583_v17  ;;  %v976_v18 = vpop.f32.mrf.mxu0  ;;  %v1057_v19 = vadd.f32 %v1056_v13, %v3147_v40  ;;  %v1136_v41 = vpop.f32.mrf.mxu2 }
 0x14b   : >> { %v2187_v22 = vperm.slane %v1835_v16, %v3396_v38  ;;  %v2185_v23 = vperm.slane %v1834_v60, %v3371_v7  ;;  %v3453_v60 = vadd.s32 4294967248, %v3309_v52  ;;  %v977_v20 = vadd.f32 %v976_v18, %v3147_v40 }
 0x14c   : >> { %v2125_v27 = vperm.slane %v1803_v59, %v3396_v38  ;;  %v1463_v28 = vmul.f32 %v3151_v44, %v1332_v14 }
 0x14d   : >> { %v2186_v29 = vsel %vm2037_vm3, %v2185_v23, %v2184_v31  ;;  %1604 = vadd.xlane.f32.xlu2 %v1429_v24  ;;  %1668 = vadd.xlane.f32.xlu1 %v1461_v26  ;;  %v1214_v23 = vadd.f32 %v1213_v12, %v3147_v40  ;;  %v1269_v43 = vmax.f32 %v977_v20, 0.0  ;;  %v1216_v45 = vpop.f32.mrf.mxu3 }
 0x14e   : >> { %v2126_v36 = vsel %vm2041_vm4, %v2125_v27, %v2124_v32  ;;  %1606 = vadd.xlane.f32.xlu0 %v1430_v21  ;;  %v2188_v42 = vsel %vm2041_vm4, %v2187_v22, %v2186_v29  ;;  %v1462_v32 = vmul.f32 %v3151_v44, %v1331_v34  ;;  %v1399_v21 = vmul.f32 %v3151_v44, %v1268_v9 }
 0x14f   : >> { %v1431_v22 = vmul.f32 %v3151_v44, %v1300_v8  ;;  %v1301_v34 = vmax.f32 %v1057_v19, 0.0 }
 0x150   : >> { %v1521_v46 = vpop.xlane.xlu2 %1520  ;;  %v1711_v47 = vpop.xlane.xlu1 %1710 }
 0x151   : >> { %v1772_v31 = vadd.f32 %v3305_v49, %v1521_v46  ;;  %v1867_v48 = vadd.f32 %v3305_v49, %v1711_v47  ;;  %v1649_v50 = vpop.xlane.xlu0 %1648  ;;  %v1364_v46 = vmax.f32 %v1214_v23, 0.0  ;;  %v1137_v47 = vadd.f32 %v1136_v41, %v3147_v40 }
 0x152   : >> { %v1836_v54 = vadd.f32 %v3305_v49, %v1649_v50  ;;  %v1432_v53 = vmul.f32 %v3151_v44, %v1301_v34  ;;  %v978_v14 = vpop.f32.mrf.mxu0 }
 0x153   : >> { %v2044_v55 = vperm.slane %v1772_v31, %v3435_v25  ;;  %v2249_v56 = vperm.slane %v1867_v48, %v3396_v38  ;;  %v979_v23 = vadd.f32 %v978_v14, %v3147_v40 }
 0x154   : >> { %v2189_v57 = vperm.slane %v1836_v54, %v3435_v25 }
 0x155   : >> { %v2046_v62 = vsel %vm2045_vm5, %v2044_v55, %v2042_v10  ;;  %v2250_v63 = vsel %vm2041_vm4, %v2249_v56, %v2248_v6  ;;  %1670 = vadd.xlane.f32.xlu2 %v1462_v32  ;;  %1542 = vadd.xlane.f32.xlu1 %v1398_v33  ;;  %v1217_v33 = vadd.f32 %v1216_v45, %v3147_v40 }
 0x156   : >> { %v2190_v11 = vsel %vm2045_vm5, %v2189_v57, %v2188_v42  ;;  %1734 = vadd.xlane.f32.xlu0 %v1494_v39  ;;  %v1400_v39 = vmul.f32 %v3151_v44, %v1269_v43  ;;  %v1495_v57 = vmul.f32 %v3151_v44, %v1364_v46 }
 0x157   : >> { %v1365_v12 = vmax.f32 %v1217_v33, 0.0 }
 0x158   : >> { %v1713_v15 = vpop.xlane.xlu2 %1712  ;;  %v1585_v16 = vpop.xlane.xlu1 %1584 }
 0x159   : >> { %v1868_v17 = vadd.f32 %v3305_v49, %v1713_v15  ;;  %v1804_v10 = vadd.f32 %v3305_v49, %v1585_v16  ;;  %v1523_v6 = vpop.xlane.xlu0 %1522  ;;  %v1138_v15 = vpop.f32.mrf.mxu2  ;;  %v3486_v16 = vadd.s32 4294967240, %v3309_v52  ;;  %v1496_v20 = vmul.f32 %v3151_v44, %v1365_v12 }
 0x15a   : >> { %v1773_v59 = vadd.f32 %v3305_v49, %v1523_v6  ;;  %v981_v46 = vpop.f32.mrf.mxu0 }
 0x15b   : >> { %v2251_v24 = vperm.slane %v1868_v17, %v3435_v25  ;;  %v2127_v26 = vperm.slane %v1804_v10, %v3435_v25 }
 0x15c   : >> { %v2048_v27 = vperm.slane %v1773_v59, %v3453_v60 }
 0x15d   : >> { %v2252_v29 = vsel %vm2045_vm5, %v2251_v24, %v2250_v63  ;;  %v2128_v30 = vsel %vm2045_vm5, %v2127_v26, %v2126_v36  ;;  %1544 = vadd.xlane.f32.xlu2 %v1399_v21  ;;  %1608 = vadd.xlane.f32.xlu1 %v1431_v22  ;;  %v1058_v36 = vpop.f32.mrf.mxu1  ;;  %v1333_v63 = vmax.f32 %v1137_v47, 0.0  ;;  %v1139_v24 = vadd.f32 %v1138_v15, %v3147_v40 }
 0x15e   : >> { %v2050_v42 = vsel %vm2049_vm6, %v2048_v27, %v2046_v62  ;;  %1672 = vadd.xlane.f32.xlu0 %v1463_v28  ;;  %v1059_v62 = vadd.f32 %v1058_v36, %v3147_v40  ;;  %v1270_v47 = vmax.f32 %v979_v23, 0.0 }
 0x15f   : >> { %v1464_v21 = vmul.f32 %v3151_v44, %v1333_v63 }
 0x160   : >> { %v1587_v31 = vpop.xlane.xlu2 %1586  ;;  %v1651_v48 = vpop.xlane.xlu1 %1650  ;;  %v1302_v17 = vmax.f32 %v1059_v62, 0.0  ;;  %v1401_v63 = vmul.f32 %v3151_v44, %v1270_v47 }
 0x161   : >> { %v1805_v50 = vadd.f32 %v3305_v49, %v1587_v31  ;;  %v1837_v51 = vadd.f32 %v3305_v49, %v1651_v48  ;;  %v1715_v32 = vpop.xlane.xlu0 %1714  ;;  %v1334_v31 = vmax.f32 %v1139_v24, 0.0  ;;  %v3504_v48 = vadd.s32 4294967232, %v3309_v52 }
 0x162   : >> { %v1869_v54 = vadd.f32 %v3305_v49, %v1715_v32  ;;  %v983_v24 = vpop.f32.mrf.mxu0 }
 0x163   : >> { %v2129_v55 = vperm.slane %v1805_v50, %v3453_v60  ;;  %v2191_v56 = vperm.slane %v1837_v51, %v3453_v60  ;;  %v1465_v62 = vmul.f32 %v3151_v44, %v1334_v31  ;;  %v984_v47 = vadd.f32 %v983_v24, %v3147_v40 }
 0x164   : >> { %v2253_v61 = vperm.slane %v1869_v54, %v3453_v60  ;;  %v982_v54 = vadd.f32 %v981_v46, %v3147_v40 }
 0x165   : >> { %v2130_v8 = vsel %vm2049_vm6, %v2129_v55, %v2128_v30  ;;  %v2192_v9 = vsel %vm2049_vm6, %v2191_v56, %v2190_v11  ;;  %1610 = vadd.xlane.f32.xlu2 %v1432_v53  ;;  %1736 = vadd.xlane.f32.xlu1 %v1495_v57  ;;  %v1218_v11 = vpop.f32.mrf.mxu3  ;;  %v1433_v30 = vmul.f32 %v3151_v44, %v1302_v17  ;;  %v1061_v43 = vpop.f32.mrf.mxu1 }
 0x166   : >> { %v2254_v13 = vsel %vm2049_vm6, %v2253_v61, %v2252_v29  ;;  %1546 = vadd.xlane.f32.xlu0 %v1400_v39  ;;  %v1219_v29 = vadd.f32 %v1218_v11, %v3147_v40  ;;  %v1062_v36 = vadd.f32 %v1061_v43, %v3147_v40  ;;  %v1141_v39 = vpop.f32.mrf.mxu2  ;;  %v1271_v17 = vmax.f32 %v982_v54, 0.0 }
 0x167   : >> { %v1142_v56 = vadd.f32 %v1141_v39, %v3147_v40 }
 0x168   : >> { %v1653_v10 = vpop.xlane.xlu2 %1652  ;;  %v1525_v6 = vpop.xlane.xlu1 %1524  ;;  %v1366_v50 = vmax.f32 %v1219_v29, 0.0  ;;  %v1303_v12 = vmax.f32 %v1062_v36, 0.0 }
 0x169   : >> { %v1838_v18 = vadd.f32 %v3305_v49, %v1653_v10  ;;  %v1774_v19 = vadd.f32 %v3305_v49, %v1525_v6  ;;  %v1589_v59 = vpop.xlane.xlu0 %1588 }
 0x16a   : >> { %v1806_v22 = vadd.f32 %v3305_v49, %v1589_v59 }
 0x16b   : >> { %v2193_v26 = vperm.slane %v1838_v18, %v3486_v16  ;;  %v2052_v27 = vperm.slane %v1774_v19, %v3486_v16  ;;  %v1335_v18 = vmax.f32 %v1142_v56, 0.0 }
 0x16c   : >> { %v2131_v28 = vperm.slane %v1806_v22, %v3486_v16 }
 0x16d   : >> { %v2194_v34 = vsel %vm2053_vm7, %v2193_v26, %v2192_v9  ;;  %v2054_v41 = vsel %vm2053_vm7, %v2052_v27, %v2050_v42  ;;  %1738 = vadd.xlane.f32.xlu2 %v1496_v20  ;;  %1674 = vadd.xlane.f32.xlu1 %v1464_v21  ;;  %v1497_v9 = vmul.f32 %v3151_v44, %v1366_v50  ;;  %v1221_v10 = vpop.f32.mrf.mxu3  ;;  %v1063_v19 = vpop.f32.mrf.mxu1  ;;  %v3523_v21 = vadd.s32 4294967224, %v3309_v52 }
 0x16e   : >> { %v2132_v45 = vsel %vm2053_vm7, %v2131_v28, %v2130_v8  ;;  %1612 = vadd.xlane.f32.xlu0 %v1433_v30  ;;  %v1222_v59 = vadd.f32 %v1221_v10, %v3147_v40  ;;  %v1402_v26 = vmul.f32 %v3151_v44, %v1271_v17  ;;  %v1434_v27 = vmul.f32 %v3151_v44, %v1303_v12  ;;  %v1143_v43 = vpop.f32.mrf.mxu2 }
 0x16f   : >> { %v1064_v28 = vadd.f32 %v1063_v19, %v3147_v40  ;;  %v1466_v30 = vmul.f32 %v3151_v44, %v1335_v18 }
 0x170   : >> { %v1527_v51 = vpop.xlane.xlu2 %1526  ;;  %v1717_v32 = vpop.xlane.xlu1 %1716  ;;  %v1367_v31 = vmax.f32 %v1222_v59, 0.0 }
 0x171   : >> { %v1775_v33 = vadd.f32 %v3305_v49, %v1527_v51  ;;  %v1870_v42 = vadd.f32 %v3305_v49, %v1717_v32  ;;  %v1655_v53 = vpop.xlane.xlu0 %1654  ;;  %v1304_v32 = vmax.f32 %v1064_v28, 0.0  ;;  %v986_v59 = vpop.f32.mrf.mxu0 }
 0x172   : >> { %v1839_v55 = vadd.f32 %v3305_v49, %v1655_v53 }
 0x173   : >> { %v2056_v57 = vperm.slane %v1775_v33, %v3504_v48  ;;  %v2255_v61 = vperm.slane %v1870_v42, %v3486_v16  ;;  %v1272_v42 = vmax.f32 %v984_v47, 0.0 }
 0x174   : >> { %v2195_v8 = vperm.slane %v1839_v55, %v3504_v48 }
 0x175   : >> { %v2058_v14 = vsel %vm2057_vm8, %v2056_v57, %v2054_v41  ;;  %v2256_v15 = vsel %vm2053_vm7, %v2255_v61, %v2254_v13  ;;  %1676 = vadd.xlane.f32.xlu2 %v1465_v62  ;;  %1548 = vadd.xlane.f32.xlu1 %v1401_v63  ;;  %v1223_v33 = vpop.f32.mrf.mxu3  ;;  %v1066_v57 = vpop.f32.mrf.mxu1  ;;  %v1498_v61 = vmul.f32 %v3151_v44, %v1367_v31 }
 0x176   : >> { %v2196_v6 = vsel %vm2057_vm8, %v2195_v8, %v2194_v34  ;;  %1740 = vadd.xlane.f32.xlu0 %v1497_v9  ;;  %v1067_v62 = vadd.f32 %v1066_v57, %v3147_v40  ;;  %v1435_v63 = vmul.f32 %v3151_v44, %v1304_v32  ;;  %v1144_v8 = vadd.f32 %v1143_v43, %v3147_v40 }
 0x177   : >> { %v1224_v9 = vadd.f32 %v1223_v33, %v3147_v40  ;;  %v1403_v10 = vmul.f32 %v3151_v44, %v1272_v42 }
 0x178   : >> { %v1719_v11 = vpop.xlane.xlu2 %1718  ;;  %v1591_v20 = vpop.xlane.xlu1 %1590 }
 0x179   : >> { %v1871_v22 = vadd.f32 %v3305_v49, %v1719_v11  ;;  %v1807_v13 = vadd.f32 %v3305_v49, %v1591_v20  ;;  %v1529_v23 = vpop.xlane.xlu0 %1528  ;;  %v1305_v20 = vmax.f32 %v1067_v62, 0.0 }
 0x17a   : >> { %v1776_v29 = vadd.f32 %v3305_v49, %v1529_v23  ;;  %v3555_v23 = vadd.s32 4294967216, %v3309_v52 }
 0x17b   : >> { %v2257_v34 = vperm.slane %v1871_v22, %v3504_v48  ;;  %v2133_v41 = vperm.slane %v1807_v13, %v3504_v48  ;;  %v1336_v22 = vmax.f32 %v1144_v8, 0.0  ;;  %v1368_v13 = vmax.f32 %v1224_v9, 0.0 }
 0x17c   : >> { %v2060_v46 = vperm.slane %v1776_v29, %v3523_v21 }
 0x17d   : >> { %v2258_v50 = vsel %vm2057_vm8, %v2257_v34, %v2256_v15  ;;  %v2134_v51 = vsel %vm2057_vm8, %v2133_v41, %v2132_v45  ;;  %1550 = vadd.xlane.f32.xlu2 %v1402_v26  ;;  %1614 = vadd.xlane.f32.xlu1 %v1434_v27  ;;  %v1146_v15 = vpop.f32.mrf.mxu2  ;;  %v987_v27 = vadd.f32 %v986_v59, %v3147_v40  ;;  %v1226_v34 = vpop.f32.mrf.mxu3 }
 0x17e   : >> { %v2062_v36 = vsel %vm2061_vm9, %v2060_v46, %v2058_v14  ;;  %1678 = vadd.xlane.f32.xlu0 %v1466_v30  ;;  %v1147_v30 = vadd.f32 %v1146_v15, %v3147_v40  ;;  %v1227_v43 = vadd.f32 %v1226_v34, %v3147_v40  ;;  %v1436_v46 = vmul.f32 %v3151_v44, %v1305_v20 }
 0x17f   : >> { %v1273_v33 = vmax.f32 %v987_v27, 0.0 }
 0x180   : >> { %v1593_v53 = vpop.xlane.xlu2 %1592  ;;  %v1657_v54 = vpop.xlane.xlu1 %1656  ;;  %v1369_v57 = vmax.f32 %v1227_v43, 0.0 }
 0x181   : >> { %v1808_v39 = vadd.f32 %v3305_v49, %v1593_v53  ;;  %v1840_v55 = vadd.f32 %v3305_v49, %v1657_v54  ;;  %v1721_v56 = vpop.xlane.xlu0 %1720  ;;  %v1068_v54 = vpop.f32.mrf.mxu1  ;;  %v1404_v15 = vmul.f32 %v3151_v44, %v1273_v33 }
 0x182   : >> { %v1872_v45 = vadd.f32 %v3305_v49, %v1721_v56  ;;  %v1069_v62 = vadd.f32 %v1068_v54, %v3147_v40 }
 0x183   : >> { %v2135_v12 = vperm.slane %v1808_v39, %v3523_v21  ;;  %v2197_v14 = vperm.slane %v1840_v55, %v3523_v21  ;;  %v1337_v39 = vmax.f32 %v1147_v30, 0.0 }
 0x184   : >> { %v2259_v17 = vperm.slane %v1872_v45, %v3523_v21  ;;  %v3573_v45 = vadd.s32 4294967208, %v3309_v52 }
 0x185   : >> { %v2136_v18 = vsel %vm2061_vm9, %v2135_v12, %v2134_v51  ;;  %v2198_v19 = vsel %vm2061_vm9, %v2197_v14, %v2196_v6  ;;  %1616 = vadd.xlane.f32.xlu2 %v1435_v63  ;;  %1742 = vadd.xlane.f32.xlu1 %v1498_v61  ;;  %v1467_v51 = vmul.f32 %v3151_v44, %v1336_v22  ;;  %v1148_v55 = vpop.f32.mrf.mxu2  ;;  %v988_v61 = vpop.f32.mrf.mxu0 }
 0x186   : >> { %v2260_v11 = vsel %vm2061_vm9, %v2259_v17, %v2258_v50  ;;  %1552 = vadd.xlane.f32.xlu0 %v1403_v10  ;;  %v1499_v50 = vmul.f32 %v3151_v44, %v1368_v13  ;;  %v1468_v14 = vmul.f32 %v3151_v44, %v1337_v39  ;;  %v989_v17 = vadd.f32 %v988_v61, %v3147_v40 }
 0x187   : >> { %v1149_v22 = vadd.f32 %v1148_v55, %v3147_v40 }
 0x188   : >> { %v1659_v24 = vpop.xlane.xlu2 %1658  ;;  %v1531_v26 = vpop.xlane.xlu1 %1530  ;;  %v1274_v27 = vmax.f32 %v989_v17, 0.0 }
 0x189   : >> { %v1841_v28 = vadd.f32 %v3305_v49, %v1659_v24  ;;  %v1777_v6 = vadd.f32 %v3305_v49, %v1531_v26  ;;  %v1595_v29 = vpop.xlane.xlu0 %1594  ;;  %v1306_v26 = vmax.f32 %v1069_v62, 0.0  ;;  %v1338_v34 = vmax.f32 %v1149_v22, 0.0 }
 0x18a   : >> { %v1809_v41 = vadd.f32 %v3305_v49, %v1595_v29  ;;  %v1071_v29 = vpop.f32.mrf.mxu1 }
 0x18b   : >> { %v2199_v47 = vperm.slane %v1841_v28, %v3555_v23  ;;  %v2064_v31 = vperm.slane %v1777_v6, %v3555_v23  ;;  %v1228_v6 = vpop.f32.mrf.mxu3  ;;  %v1469_v61 = vmul.f32 %v3151_v44, %v1338_v34 }
 0x18c   : >> { %v2137_v32 = vperm.slane %v1809_v41, %v3555_v23  ;;  %v1229_v54 = vadd.f32 %v1228_v6, %v3147_v40 }
 0x18d   : >> { %v2200_v42 = vsel %vm2065_vm10, %v2199_v47, %v2198_v19  ;;  %v2066_v53 = vsel %vm2065_vm10, %v2064_v31, %v2062_v36  ;;  %1744 = vadd.xlane.f32.xlu2 %v1499_v50  ;;  %1680 = vadd.xlane.f32.xlu1 %v1467_v51  ;;  %v1151_v30 = vpop.f32.mrf.mxu2  ;;  %v991_v50 = vpop.f32.mrf.mxu0  ;;  %v1072_v51 = vadd.f32 %v1071_v29, %v3147_v40 }
 0x18e   : >> { %v2138_v56 = vsel %vm2065_vm10, %v2137_v32, %v2136_v18  ;;  %1618 = vadd.xlane.f32.xlu0 %v1436_v46  ;;  %v1500_v18 = vmul.f32 %v3151_v44, %v1369_v57  ;;  %v3591_v46 = vadd.s32 4294967200, %v3309_v52  ;;  %v992_v33 = vadd.f32 %v991_v50, %v3147_v40 }
 0x190   : >> { %v1533_v63 = vpop.xlane.xlu2 %1532  ;;  %v1723_v8 = vpop.xlane.xlu1 %1722 }
 0x191   : >> { %v1778_v9 = vadd.f32 %v3305_v49, %v1533_v63  ;;  %v1873_v36 = vadd.f32 %v3305_v49, %v1723_v8  ;;  %v1661_v12 = vpop.xlane.xlu0 %1660  ;;  %v1307_v8 = vmax.f32 %v1072_v51, 0.0 }
 0x192   : >> { %v1842_v10 = vadd.f32 %v3305_v49, %v1661_v12 }
 0x193   : >> { %v2068_v19 = vperm.slane %v1778_v9, %v3573_v45  ;;  %v2261_v59 = vperm.slane %v1873_v36, %v3555_v23  ;;  %v1275_v36 = vmax.f32 %v992_v33, 0.0  ;;  %v1231_v12 = vpop.f32.mrf.mxu3 }
 0x194   : >> { %v2201_v20 = vperm.slane %v1842_v10, %v3573_v45  ;;  %v1232_v22 = vadd.f32 %v1231_v12, %v3147_v40 }
 0x195   : >> { %v2070_v13 = vsel %vm2069_vm11, %v2068_v19, %v2066_v53  ;;  %v2262_v24 = vsel %vm2065_vm10, %v2261_v59, %v2260_v11  ;;  %1682 = vadd.xlane.f32.xlu2 %v1468_v14  ;;  %1554 = vadd.xlane.f32.xlu1 %v1404_v15  ;;  %v1437_v53 = vmul.f32 %v3151_v44, %v1306_v26  ;;  %v1370_v14 = vmax.f32 %v1229_v54, 0.0  ;;  %v1153_v26 = vpop.f32.mrf.mxu2  ;;  %v993_v51 = vpop.f32.mrf.mxu0 }
 0x196   : >> { %v2202_v28 = vsel %vm2069_vm11, %v2201_v20, %v2200_v42  ;;  %1746 = vadd.xlane.f32.xlu0 %v1500_v18  ;;  %v1405_v42 = vmul.f32 %v3151_v44, %v1274_v27  ;;  %v1152_v15 = vadd.f32 %v1151_v30, %v3147_v40  ;;  %v3610_v18 = vadd.s32 4294967192, %v3309_v52  ;;  %v1073_v20 = vpop.f32.mrf.mxu1 }
 0x197   : >> { %v1406_v27 = vmul.f32 %v3151_v44, %v1275_v36  ;;  %v1501_v30 = vmul.f32 %v3151_v44, %v1370_v14 }
 0x198   : >> { %v1725_v41 = vpop.xlane.xlu2 %1724  ;;  %v1597_v43 = vpop.xlane.xlu1 %1596 }
 0x199   : >> { %v1874_v47 = vadd.f32 %v3305_v49, %v1725_v41  ;;  %v1810_v11 = vadd.f32 %v3305_v49, %v1597_v43  ;;  %v1535_v31 = vpop.xlane.xlu0 %1534  ;;  %v1074_v41 = vadd.f32 %v1073_v20, %v3147_v40  ;;  %v1339_v43 = vmax.f32 %v1152_v15, 0.0 }
 0x19a   : >> { %v1779_v32 = vadd.f32 %v3305_v49, %v1535_v31  ;;  %v1371_v31 = vmax.f32 %v1232_v22, 0.0  ;;  %v3641_v22 = vadd.s32 4294967184, %v3309_v52 }
 0x19b   : >> { %v2263_v39 = vperm.slane %v1874_v47, %v3573_v45  ;;  %v2139_v55 = vperm.slane %v1810_v11, %v3573_v45 }
 0x19c   : >> { %v2072_v57 = vperm.slane %v1779_v32, %v3591_v46  ;;  %v1308_v32 = vmax.f32 %v1074_v41, 0.0 }
 0x19d   : >> { %v2264_v62 = vsel %vm2069_vm11, %v2263_v39, %v2262_v24  ;;  %v2140_v63 = vsel %vm2069_vm11, %v2139_v55, %v2138_v56  ;;  %1556 = vadd.xlane.f32.xlu2 %v1405_v42  ;;  %1620 = vadd.xlane.f32.xlu1 %v1437_v53  ;;  %v1233_v55 = vpop.f32.mrf.mxu3 }
 0x19e   : >> { %v2074_v9 = vsel %vm2073_vm12, %v2072_v57, %v2070_v13  ;;  %1684 = vadd.xlane.f32.xlu0 %v1469_v61  ;;  %v1438_v13 = vmul.f32 %v3151_v44, %v1307_v8  ;;  %v1502_v57 = vmul.f32 %v3151_v44, %v1371_v31  ;;  %v994_v61 = vadd.f32 %v993_v51, %v3147_v40 }
 0x19f   : >> { %v1154_v8 = vadd.f32 %v1153_v26, %v3147_v40  ;;  %v1234_v14 = vadd.f32 %v1233_v55, %v3147_v40  ;;  %v1439_v15 = vmul.f32 %v3151_v44, %v1308_v32 }
 0x1a0   : >> { %v1599_v17 = vpop.xlane.xlu2 %1598  ;;  %v1663_v10 = vpop.xlane.xlu1 %1662 }
 0x1a1   : >> { %v1811_v19 = vadd.f32 %v3305_v49, %v1599_v17  ;;  %v1843_v56 = vadd.f32 %v3305_v49, %v1663_v10  ;;  %v1601_v59 = vpop.xlane.xlu0 %1600  ;;  %v1340_v20 = vmax.f32 %v1154_v8, 0.0 }
 0x1a2   : >> { %v1812_v24 = vadd.f32 %v3305_v49, %v1601_v59  ;;  %v996_v59 = vpop.f32.mrf.mxu0 }
 0x1a3   : >> { %v2141_v6 = vperm.slane %v1811_v19, %v3591_v46  ;;  %v2203_v29 = vperm.slane %v1843_v56, %v3591_v46  ;;  %v1076_v19 = vpop.f32.mrf.mxu1  ;;  %v1276_v56 = vmax.f32 %v994_v61, 0.0  ;;  %v1471_v51 = vmul.f32 %v3151_v44, %v1340_v20 }
 0x1a4   : >> { %v2143_v34 = vperm.slane %v1812_v24, %v3610_v18  ;;  %v1372_v24 = vmax.f32 %v1234_v14, 0.0 }
 0x1a5   : >> { %v2142_v47 = vsel %vm2073_vm12, %v2141_v6, %v2140_v63  ;;  %v2204_v11 = vsel %vm2073_vm12, %v2203_v29, %v2202_v28  ;;  %1622 = vadd.xlane.f32.xlu2 %v1438_v13  ;;  %1748 = vadd.xlane.f32.xlu1 %v1501_v30  ;;  %v1470_v28 = vmul.f32 %v3151_v44, %v1339_v43  ;;  %v1156_v63 = vpop.f32.mrf.mxu2 }
 0x1a6   : >> { %v3626_v50 = vsel %vm2077_vm13, %v2143_v34, %v2142_v47  ;;  %1558 = vadd.xlane.f32.xlu0 %v1406_v27  ;;  %v1077_v6 = vadd.f32 %v1076_v19, %v3147_v40  ;;  %v997_v30 = vadd.f32 %v996_v59, %v3147_v40  ;;  %v1157_v41 = vadd.f32 %v1156_v63, %v3147_v40 }
 0x1a7   : >> { %v1407_v43 = vmul.f32 %v3151_v44, %v1276_v56  ;;  %v3665_v19 = vadd.s32 4294967176, %v3309_v52 }
 0x1a8   : >> { %v1727_v33 = vpop.xlane.xlu2 %1726  ;;  %v1537_v42 = vpop.xlane.xlu1 %1536  ;;  %v1341_v63 = vmax.f32 %v1157_v41, 0.0 }
 0x1a9   : >> { %v1875_v53 = vadd.f32 %v3305_v49, %v1727_v33  ;;  %v1780_v54 = vadd.f32 %v3305_v49, %v1537_v42  ;;  %v1667_v39 = vpop.xlane.xlu0 %1666  ;;  %v1236_v42 = vpop.f32.mrf.mxu3 }
 0x1aa   : >> { %v1845_v13 = vadd.f32 %v3305_v49, %v1667_v39  ;;  %v1309_v39 = vmax.f32 %v1077_v6, 0.0  ;;  %v998_v59 = vpop.f32.mrf.mxu0 }
 0x1ab   : >> { %v2265_v36 = vperm.slane %v1875_v53, %v3591_v46  ;;  %v2076_v12 = vperm.slane %v1780_v54, %v3610_v18  ;;  %v1503_v53 = vmul.f32 %v3151_v44, %v1372_v24 }
 0x1ac   : >> { %v2207_v32 = vperm.slane %v1845_v13, %v3641_v22  ;;  %v1440_v13 = vmul.f32 %v3151_v44, %v1309_v39 }
 0x1ad   : >> { %v2266_v17 = vsel %vm2073_vm12, %v2265_v36, %v2264_v62  ;;  %v2078_v10 = vsel %vm2077_vm13, %v2076_v12, %v2074_v9  ;;  %1750 = vadd.xlane.f32.xlu2 %v1502_v57  ;;  %1686 = vadd.xlane.f32.xlu1 %v1470_v28  ;;  %v1158_v54 = vpop.f32.mrf.mxu2  ;;  %v1277_v28 = vmax.f32 %v997_v30, 0.0  ;;  %v1078_v36 = vpop.f32.mrf.mxu1  ;;  %v1237_v12 = vadd.f32 %v1236_v42, %v3147_v40 }
 0x1ae   : >> { %1624 = vadd.xlane.f32.xlu0 %v1439_v15 }
 0x1af   : >> { %v1408_v20 = vmul.f32 %v3151_v44, %v1277_v28  ;;  %v1373_v30 = vmax.f32 %v1237_v12, 0.0 }
 0x1b0   : >> { %v1665_v26 = vpop.xlane.xlu2 %1664  ;;  %v1729_v27 = vpop.xlane.xlu1 %1728 }
 0x1b1   : >> { %v1844_v62 = vadd.f32 %v3305_v49, %v1665_v26  ;;  %v1876_v9 = vadd.f32 %v3305_v49, %v1729_v27  ;;  %v1731_v29 = vpop.xlane.xlu0 %1730  ;;  %v1472_v26 = vmul.f32 %v3151_v44, %v1341_v63  ;;  %v1079_v27 = vadd.f32 %v1078_v36, %v3147_v40 }
 0x1b2   : >> { %v1877_v34 = vadd.f32 %v3305_v49, %v1731_v29  ;;  %v999_v29 = vadd.f32 %v998_v59, %v3147_v40 }
 0x1b3   : >> { %v2205_v47 = vperm.slane %v1844_v62, %v3610_v18  ;;  %v2267_v31 = vperm.slane %v1876_v9, %v3610_v18 }
 0x1b4   : >> { %v2269_v33 = vperm.slane %v1877_v34, %v3641_v22 }
 0x1b5   : >> { %v2206_v55 = vsel %vm2077_vm13, %v2205_v47, %v2204_v11  ;;  %v2268_v57 = vsel %vm2077_vm13, %v2267_v31, %v2266_v17  ;;  %1688 = vadd.xlane.f32.xlu2 %v1471_v51  ;;  %1560 = vadd.xlane.f32.xlu1 %v1407_v43  ;;  %v1238_v47 = vpop.f32.mrf.mxu3  ;;  %v1161_v31 = vpop.f32.mrf.mxu2  ;;  %v1310_v51 = vmax.f32 %v1079_v27, 0.0 }
 0x1b6   : >> { %v3660_v61 = vsel %vm2081_vm14, %v2269_v33, %v2268_v57  ;;  %1752 = vadd.xlane.f32.xlu0 %v1503_v53  ;;  %v2208_v8 = vsel %vm2081_vm14, %v2207_v32, %v2206_v55  ;;  %v1278_v32 = vmax.f32 %v999_v29, 0.0  ;;  %v1162_v55 = vadd.f32 %v1161_v31, %v3147_v40 }
 0x1b7   : >> { %v1159_v57 = vadd.f32 %v1158_v54, %v3147_v40  ;;  %v1441_v36 = vmul.f32 %v3151_v44, %v1310_v51  ;;  %v1239_v12 = vadd.f32 %v1238_v47, %v3147_v40  ;;  %v1001_v54 = vpop.f32.mrf.mxu0 }
 0x1b8   : >> { %v1539_v14 = vpop.xlane.xlu2 %1538  ;;  %v1603_v15 = vpop.xlane.xlu1 %1602  ;;  %v1002_v27 = vadd.f32 %v1001_v54, %v3147_v40 }
 0x1b9   : >> { %v1781_v11 = vadd.f32 %v3305_v49, %v1539_v14  ;;  %v1813_v17 = vadd.f32 %v3305_v49, %v1603_v15  ;;  %v1541_v56 = vpop.xlane.xlu0 %1540  ;;  %v1081_v14 = vpop.f32.mrf.mxu1  ;;  %v1409_v15 = vmul.f32 %v3151_v44, %v1278_v32 }
 0x1ba   : >> { %v1782_v24 = vadd.f32 %v3305_v49, %v1541_v56  ;;  %v1343_v56 = vmax.f32 %v1162_v55, 0.0  ;;  %v1082_v29 = vadd.f32 %v1081_v14, %v3147_v40 }
 0x1bb   : >> { %v2080_v6 = vperm.slane %v1781_v11, %v3641_v22  ;;  %v2145_v62 = vperm.slane %v1813_v17, %v3641_v22 }
 0x1bc   : >> { %v2084_v9 = vperm.slane %v1782_v24, %v3665_v19 }
 0x1bd   : >> { %v2082_v34 = vsel %vm2081_vm14, %v2080_v6, %v2078_v10  ;;  %v2146_v41 = vsel %vm2081_vm14, %v2145_v62, %v3626_v50  ;;  %1562 = vadd.xlane.f32.xlu2 %v1408_v20  ;;  %1626 = vadd.xlane.f32.xlu1 %v1440_v13  ;;  %v1504_v50 = vmul.f32 %v3151_v44, %v1373_v30  ;;  %v1241_v59 = vpop.f32.mrf.mxu3  ;;  %v1342_v20 = vmax.f32 %v1159_v57, 0.0  ;;  %v1163_v30 = vpop.f32.mrf.mxu2 }
 0x1be   : >> { %v3682_v43 = vsel %vm2085_vm15, %v2084_v9, %v2082_v34  ;;  %1690 = vadd.xlane.f32.xlu0 %v1472_v26  ;;  %v1374_v13 = vmax.f32 %v1239_v12, 0.0  ;;  %v1242_v62 = vadd.f32 %v1241_v59, %v3147_v40  ;;  %v1474_v9 = vmul.f32 %v3151_v44, %v1343_v56 }
 0x1c0   : >> { %v1605_v33 = vpop.xlane.xlu2 %1604  ;;  %v1669_v42 = vpop.xlane.xlu1 %1668  ;;  %v1505_v34 = vmul.f32 %v3151_v44, %v1374_v13  ;;  %v1375_v47 = vmax.f32 %v1242_v62, 0.0  ;;  %v1164_v13 = vadd.f32 %v1163_v30, %v3147_v40 }
 0x1c1   : >> { %v1814_v53 = vadd.f32 %v3305_v49, %v1605_v33  ;;  %v1846_v39 = vadd.f32 %v3305_v49, %v1669_v42  ;;  %v1607_v10 = vpop.xlane.xlu0 %1606  ;;  %v1083_v31 = vpop.f32.mrf.mxu1  ;;  %v1311_v42 = vmax.f32 %v1082_v29, 0.0 }
 0x1c2   : >> { %v1815_v51 = vadd.f32 %v3305_v49, %v1607_v10  ;;  %v1003_v33 = vpop.f32.mrf.mxu0  ;;  %v1084_v10 = vadd.f32 %v1083_v31, %v3147_v40  ;;  %v1344_v31 = vmax.f32 %v1164_v13, 0.0 }
 0x1c3   : >> { %v2147_v28 = vperm.slane %v1814_v53, %v3665_v19  ;;  %v2209_v63 = vperm.slane %v1846_v39, %v3665_v19  ;;  %v1004_v12 = vadd.f32 %v1003_v33, %v3147_v40 }
 0x1c4   : >> { %v1312_v29 = vmax.f32 %v1084_v10, 0.0 }
 0x1c5   : >> { %v3695_v11 = vsel %vm2085_vm15, %v2147_v28, %v2146_v41  ;;  %v3698_v17 = vsel %vm2085_vm15, %v2209_v63, %v2208_v8  ;;  %1628 = vadd.xlane.f32.xlu2 %v1441_v36  ;;  %1754 = vadd.xlane.f32.xlu1 %v1504_v50  ;;  %v1473_v8 = vmul.f32 %v3151_v44, %v1342_v20  ;;  %v1279_v41 = vmax.f32 %v1002_v27, 0.0  ;;  %v1166_v27 = vpop.f32.mrf.mxu2  ;;  %v1243_v30 = vpop.f32.mrf.mxu3 }
 0x1c6   : >> { %1564 = vadd.xlane.f32.xlu0 %v1409_v15  ;;  %v1506_v63 = vmul.f32 %v3151_v44, %v1375_v47  ;;  %v2149_v15 = vperm.slane %v1815_v51, %v3309_v52 }
 0x1c7   : >> { %v1410_v36 = vmul.f32 %v3151_v44, %v1279_v41 }
 0x1c8   : >> { %v1671_v24 = vpop.xlane.xlu2 %1670  ;;  %v1543_v26 = vpop.xlane.xlu1 %1542 }
 0x1c9   : >> { %v1735_v6 = vpop.xlane.xlu0 %1734  ;;  %v1783_v32 = vadd.f32 %v3305_v49, %v1543_v26  ;;  %v1847_v53 = vadd.f32 %v3305_v49, %v1671_v24  ;;  %v1442_v26 = vmul.f32 %v3151_v44, %v1311_v42  ;;  %v1086_v41 = vpop.f32.mrf.mxu1 }
 0x1ca   : >> { %v1879_v47 = vadd.f32 %v3305_v49, %v1735_v6  ;;  %v1443_v6 = vmul.f32 %v3151_v44, %v1312_v29 }
 0x1cb   : >> { %v2087_v56 = vperm.slane %v1783_v32, %v3309_v52  ;;  %v2211_v20 = vperm.slane %v1847_v53, %v3309_v52 }
 0x1cd   : >> { %1694 = vadd.xlane.f32.xlu2 %v1474_v9  ;;  %1692 = vadd.xlane.f32.xlu1 %v1473_v8  ;;  %v1280_v8 = vmax.f32 %v1004_v12, 0.0  ;;  %v1168_v13 = vpop.f32.mrf.mxu2 }
 0x1ce   : >> { %1756 = vadd.xlane.f32.xlu0 %v1505_v34 }
 0x1d0   : >> { %v1545_v39 = vpop.xlane.xlu2 %1544  ;;  %v1609_v55 = vpop.xlane.xlu1 %1608 }
 0x1d1   : >> { %v1784_v50 = vadd.f32 %v3305_v49, %v1545_v39  ;;  %v1816_v57 = vadd.f32 %v3305_v49, %v1609_v55  ;;  %v1673_v28 = vpop.xlane.xlu0 %1672  ;;  %v1006_v39 = vpop.f32.mrf.mxu0  ;;  %v1087_v55 = vadd.f32 %v1086_v41, %v3147_v40 }
 0x1d2   : >> { %v1848_v14 = vadd.f32 %v3305_v49, %v1673_v28  ;;  %v1411_v28 = vmul.f32 %v3151_v44, %v1280_v8 }
 0x1d3   : >> { %v2088_v54 = vperm.slane %v1784_v50, %v3314_v58  ;;  %v2150_v59 = vperm.slane %v1816_v57, %v3314_v58  ;;  %v1007_v57 = vadd.f32 %v1006_v39, %v3147_v40 }
 0x1d4   : >> { %v2212_v24 = vperm.slane %v1848_v14, %v3314_v58 }
 0x1d5   : >> { %v2089_v62 = vsel %vm2029_vm1, %v2088_v54, %v2087_v56  ;;  %v2151_v9 = vsel %vm2029_vm1, %v2150_v59, %v2149_v15  ;;  %1758 = vadd.xlane.f32.xlu2 %v1506_v63  ;;  %1566 = vadd.xlane.f32.xlu1 %v1410_v36  ;;  %v2273_v63 = vperm.slane %v1879_v47, %v3309_v52  ;;  %v1313_v59 = vmax.f32 %v1087_v55, 0.0  ;;  %v1088_v47 = vpop.f32.mrf.mxu1 }
 0x1d6   : >> { %v2213_v34 = vsel %vm2029_vm1, %v2212_v24, %v2211_v20  ;;  %1630 = vadd.xlane.f32.xlu0 %v1442_v26  ;;  %v1244_v36 = vadd.f32 %v1243_v30, %v3147_v40  ;;  %v1475_v15 = vmul.f32 %v3151_v44, %v1344_v31  ;;  %v1281_v52 = vmax.f32 %v1007_v57, 0.0 }
 0x1d7   : >> { %v1167_v26 = vadd.f32 %v1166_v27, %v3147_v40  ;;  %v1169_v30 = vadd.f32 %v1168_v13, %v3147_v40  ;;  %v1444_v31 = vmul.f32 %v3151_v44, %v1313_v59  ;;  %v1209_v59 = vadd.f32 %v3393_v37, %v3147_v40 }
 0x1d8   : >> { %v1611_v51 = vpop.xlane.xlu2 %1610  ;;  %v1737_v32 = vpop.xlane.xlu1 %1736  ;;  %v1376_v24 = vmax.f32 %v1244_v36, 0.0 }
 0x1d9   : >> { %v1817_v33 = vadd.f32 %v3305_v49, %v1611_v51  ;;  %v1880_v42 = vadd.f32 %v3305_v49, %v1737_v32  ;;  %v1547_v53 = vpop.xlane.xlu0 %1546  ;;  %v1412_v51 = vmul.f32 %v3151_v44, %v1281_v52  ;;  %v1345_v39 = vmax.f32 %v1167_v26, 0.0 }
 0x1da   : >> { %v1785_v50 = vadd.f32 %v3305_v49, %v1547_v53  ;;  %v1089_v53 = vadd.f32 %v1088_v47, %v3147_v40  ;;  %v1346_v57 = vmax.f32 %v1169_v30, 0.0  ;;  %v1362_v37 = vmax.f32 %v1209_v59, 0.0 }
 0x1db   : >> { %v2152_v12 = vperm.slane %v1817_v33, %v3345_v35  ;;  %v2274_v10 = vperm.slane %v1880_v42, %v3314_v58  ;;  %v1507_v33 = vmul.f32 %v3151_v44, %v1376_v24 }
 0x1dc   : >> { %v2090_v14 = vperm.slane %v1785_v50, %v3345_v35 }
 0x1dd   : >> { %v2153_v56 = vsel %vm2033_vm2, %v2152_v12, %v2151_v9  ;;  %v2275_v54 = vsel %vm2029_vm1, %v2274_v10, %v2273_v63  ;;  %1568 = vadd.xlane.f32.xlu2 %v1411_v28  ;;  %1632 = vadd.xlane.f32.xlu1 %v1443_v6  ;;  %v1246_v28 = vpop.f32.mrf.mxu3  ;;  %v1008_v63 = vpop.f32.mrf.mxu0  ;;  %vm2306_vm1 = vcmask 1042434  }
 0x1de   : >> { %v2091_v20 = vsel %vm2033_vm2, %v2090_v14, %v2089_v62  ;;  %1696 = vadd.xlane.f32.xlu0 %v1475_v15  ;;  %v1247_v26 = vadd.f32 %v1246_v28, %v3147_v40 }
 0x1e0   : >> { %v1739_v58 = vpop.xlane.xlu2 %1738  ;;  %v1675_v8 = vpop.xlane.xlu1 %1674 }
 0x1e1   : >> { %v1881_v29 = vadd.f32 %v3305_v49, %v1739_v58  ;;  %v1849_v41 = vadd.f32 %v3305_v49, %v1675_v8  ;;  %v1613_v9 = vpop.xlane.xlu0 %1612 }
 0x1e2   : >> { %v1818_v62 = vadd.f32 %v3305_v49, %v1613_v9 }
 0x1e3   : >> { %v2276_v32 = vperm.slane %v1881_v29, %v3345_v35  ;;  %v2214_v27 = vperm.slane %v1849_v41, %v3345_v35  ;;  %v1314_v35 = vmax.f32 %v1089_v53, 0.0 }
 0x1e4   : >> { %v2154_v42 = vperm.slane %v1818_v62, %v3371_v7 }
 0x1e5   : >> { %v2277_v55 = vsel %vm2033_vm2, %v2276_v32, %v2275_v54  ;;  %v2215_v50 = vsel %vm2033_vm2, %v2214_v27, %v2213_v34  ;;  %1634 = vadd.xlane.f32.xlu2 %v1444_v31  ;;  %1760 = vadd.xlane.f32.xlu1 %v1507_v33  ;;  %v1477_v54 = vmul.f32 %v3151_v44, %v1346_v57  ;;  %v1248_v30 = vpop.f32.mrf.mxu3  ;;  %v1377_v31 = vmax.f32 %v1247_v26, 0.0 }
 0x1e6   : >> { %v2155_v6 = vsel %vm2037_vm3, %v2154_v42, %v2153_v56  ;;  %1570 = vadd.xlane.f32.xlu0 %v1412_v51  ;;  %v1476_v34 = vmul.f32 %v3151_v44, %v1345_v39  ;;  %v1009_v56 = vadd.f32 %v1008_v63, %v3147_v40  ;;  %v1445_v8 = vmul.f32 %v3151_v44, %v1314_v35 }
 0x1e7   : >> { %v1249_v42 = vadd.f32 %v1248_v30, %v3147_v40  ;;  %v1508_v57 = vmul.f32 %v3151_v44, %v1377_v31  ;;  %vm2308_vm2 = vcmask 1043459  }
 0x1e8   : >> { %v1677_v36 = vpop.xlane.xlu2 %1676  ;;  %v1549_v12 = vpop.xlane.xlu1 %1548  ;;  %v1282_v47 = vmax.f32 %v1009_v56, 0.0 }
 0x1e9   : >> { %v1850_v10 = vadd.f32 %v3305_v49, %v1677_v36  ;;  %v1786_v14 = vadd.f32 %v3305_v49, %v1549_v12  ;;  %v1741_v15 = vpop.xlane.xlu0 %1740  ;;  %v1378_v40 = vmax.f32 %v1249_v42, 0.0 }
 0x1ea   : >> { %v1882_v52 = vadd.f32 %v3305_v49, %v1741_v15 }
 0x1eb   : >> { %v2216_v13 = vperm.slane %v1850_v10, %v3371_v7  ;;  %v2092_v24 = vperm.slane %v1786_v14, %v3371_v7 }
 0x1ec   : >> { %v2278_v58 = vperm.slane %v1882_v52, %v3371_v7 }
 0x1ed   : >> { %v2217_v29 = vsel %vm2037_vm3, %v2216_v13, %v2215_v50  ;;  %v2093_v41 = vsel %vm2037_vm3, %v2092_v24, %v2091_v20  ;;  %1700 = vadd.xlane.f32.xlu2 %v1477_v54  ;;  %1698 = vadd.xlane.f32.xlu1 %v1476_v34  ;;  %v1493_v20 = vmul.f32 %v3151_v44, %v1362_v37 }
 0x1ee   : >> { %v2279_v9 = vsel %vm2037_vm3, %v2278_v58, %v2277_v55  ;;  %1636 = vadd.xlane.f32.xlu0 %v1445_v8  ;;  %v1413_v55 = vmul.f32 %v3151_v44, %v1282_v47  ;;  %vm2310_vm3 = vcmask 1044484  }
 0x1f0   : >> { %v1551_v62 = vpop.xlane.xlu2 %1550  ;;  %v1615_v51 = vpop.xlane.xlu1 %1614 }
 0x1f1   : >> { %v1787_v32 = vadd.f32 %v3305_v49, %v1551_v62  ;;  %v1819_v7 = vadd.f32 %v3305_v49, %v1615_v51  ;;  %v1679_v27 = vpop.xlane.xlu0 %1678 }
 0x1f2   : >> { %v1851_v33 = vadd.f32 %v3305_v49, %v1679_v27 }
 0x1f3   : >> { %v2094_v53 = vperm.slane %v1787_v32, %v3396_v38  ;;  %v2156_v39 = vperm.slane %v1819_v7, %v3396_v38 }
 0x1f4   : >> { %v2218_v50 = vperm.slane %v1851_v33, %v3396_v38 }
 0x1f5   : >> { %v2095_v28 = vsel %vm2041_vm4, %v2094_v53, %v2093_v41  ;;  %v2157_v63 = vsel %vm2041_vm4, %v2156_v39, %v2155_v6  ;;  %1732 = vadd.xlane.f32.xlu2 %v1493_v20  ;;  %1572 = vadd.xlane.f32.xlu1 %v1413_v55  ;;  %v1509_v6 = vmul.f32 %v3151_v44, %v1378_v40 }
 0x1f6   : >> { %v2219_v35 = vsel %vm2041_vm4, %v2218_v50, %v2217_v29  ;;  %1762 = vadd.xlane.f32.xlu0 %v1508_v57 }
 0x1f8   : >> { %v1617_v36 = vpop.xlane.xlu2 %1616  ;;  %v1743_v12 = vpop.xlane.xlu1 %1742 }
 0x1f9   : >> { %v1820_v10 = vadd.f32 %v3305_v49, %v1617_v36  ;;  %v1883_v14 = vadd.f32 %v3305_v49, %v1743_v12  ;;  %v1553_v15 = vpop.xlane.xlu0 %1552 }
 0x1fa   : >> { %v1788_v54 = vadd.f32 %v3305_v49, %v1553_v15 }
 0x1fb   : >> { %v2158_v34 = vperm.slane %v1820_v10, %v3435_v25  ;;  %v2280_v59 = vperm.slane %v1883_v14, %v3396_v38 }
 0x1fc   : >> { %v2096_v52 = vperm.slane %v1788_v54, %v3435_v25 }
 0x1fd   : >> { %v2159_v56 = vsel %vm2045_vm5, %v2158_v34, %v2157_v63  ;;  %v2281_v13 = vsel %vm2041_vm4, %v2280_v59, %v2279_v9  ;;  %1764 = vadd.xlane.f32.xlu1 %v1509_v6  ;;  %vm2312_vm4 = vcmask 1045509  }
 0x1fe   : >> { %v2097_v24 = vsel %vm2045_vm5, %v2096_v52, %v2095_v28 }
 0x200   : >> { %v1745_v26 = vpop.xlane.xlu2 %1744  ;;  %v1681_v58 = vpop.xlane.xlu1 %1680 }
 0x201   : >> { %v1884_v8 = vadd.f32 %v3305_v49, %v1745_v26  ;;  %v1852_v29 = vadd.f32 %v3305_v49, %v1681_v58  ;;  %v1619_v41 = vpop.xlane.xlu0 %1618 }
 0x202   : >> { %v1821_v38 = vadd.f32 %v3305_v49, %v1619_v41 }
 0x203   : >> { %v2282_v44 = vperm.slane %v1884_v8, %v3435_v25  ;;  %v2220_v37 = vperm.slane %v1852_v29, %v3435_v25 }
 0x204   : >> { %v2160_v47 = vperm.slane %v1821_v38, %v3453_v60 }
 0x205   : >> { %v2283_v9 = vsel %vm2045_vm5, %v2282_v44, %v2281_v13  ;;  %v2221_v30 = vsel %vm2045_vm5, %v2220_v37, %v2219_v35  ;;  %vm2314_vm5 = vcmask 1046534  }
 0x206   : >> { %v2161_v31 = vsel %vm2049_vm6, %v2160_v47, %v2159_v56 }
 0x208   : >> { %v1683_v62 = vpop.xlane.xlu2 %1682  ;;  %v1555_v51 = vpop.xlane.xlu1 %1554 }
 0x209   : >> { %v1853_v32 = vadd.f32 %v3305_v49, %v1683_v62  ;;  %v1789_v7 = vadd.f32 %v3305_v49, %v1555_v51  ;;  %v1747_v27 = vpop.xlane.xlu0 %1746 }
 0x20a   : >> { %v1885_v33 = vadd.f32 %v3305_v49, %v1747_v27 }
 0x20b   : >> { %v2222_v20 = vperm.slane %v1853_v32, %v3453_v60  ;;  %v2098_v25 = vperm.slane %v1789_v7, %v3453_v60 }
 0x20c   : >> { %v2284_v42 = vperm.slane %v1885_v33, %v3453_v60 }
 0x20d   : >> { %v2223_v53 = vsel %vm2049_vm6, %v2222_v20, %v2221_v30  ;;  %v2099_v39 = vsel %vm2049_vm6, %v2098_v25, %v2097_v24 }
 0x20e   : >> { %v2285_v55 = vsel %vm2049_vm6, %v2284_v42, %v2283_v9  ;;  %vm2316_vm6 = vcmask 1047559  }
 0x210   : >> { %v1557_v50 = vpop.xlane.xlu2 %1556  ;;  %v1621_v57 = vpop.xlane.xlu1 %1620 }
 0x211   : >> { %v1790_v28 = vadd.f32 %v3305_v49, %v1557_v50  ;;  %v1822_v63 = vadd.f32 %v3305_v49, %v1621_v57  ;;  %v1685_v35 = vpop.xlane.xlu0 %1684 }
 0x212   : >> { %v1854_v40 = vadd.f32 %v3305_v49, %v1685_v35 }
 0x213   : >> { %v2100_v36 = vperm.slane %v1790_v28, %v3486_v16  ;;  %v2162_v12 = vperm.slane %v1822_v63, %v3486_v16 }
 0x214   : >> { %v2224_v60 = vperm.slane %v1854_v40, %v3486_v16 }
 0x215   : >> { %v2101_v10 = vsel %vm2053_vm7, %v2100_v36, %v2099_v39  ;;  %v2163_v14 = vsel %vm2053_vm7, %v2162_v12, %v2161_v31 }
 0x216   : >> { %v2225_v15 = vsel %vm2053_vm7, %v2224_v60, %v2223_v53 }
 0x218   : >> { %v1623_v54 = vpop.xlane.xlu2 %1622  ;;  %v1749_v34 = vpop.xlane.xlu1 %1748 }
 0x219   : >> { %v1823_v59 = vadd.f32 %v3305_v49, %v1623_v54  ;;  %v1886_v6 = vadd.f32 %v3305_v49, %v1749_v34  ;;  %v1559_v52 = vpop.xlane.xlu0 %1558 }
 0x21a   : >> { %v1791_v56 = vadd.f32 %v3305_v49, %v1559_v52 }
 0x21b   : >> { %v2164_v13 = vperm.slane %v1823_v59, %v3504_v48  ;;  %v2286_v24 = vperm.slane %v1886_v6, %v3486_v16 }
 0x21c   : >> { %v2102_v26 = vperm.slane %v1791_v56, %v3504_v48 }
 0x21d   : >> { %v2165_v58 = vsel %vm2057_vm8, %v2164_v13, %v2163_v14  ;;  %v2287_v8 = vsel %vm2053_vm7, %v2286_v24, %v2285_v55 }
 0x21e   : >> { %v2103_v29 = vsel %vm2057_vm8, %v2102_v26, %v2101_v10 }
 0x220   : >> { %v1751_v41 = vpop.xlane.xlu2 %1750  ;;  %v1687_v38 = vpop.xlane.xlu1 %1686 }
 0x221   : >> { %v1887_v44 = vadd.f32 %v3305_v49, %v1751_v41  ;;  %v1855_v37 = vadd.f32 %v3305_v49, %v1687_v38  ;;  %v1625_v47 = vpop.xlane.xlu0 %1624 }
 0x222   : >> { %v1824_v40 = vadd.f32 %v3305_v49, %v1625_v47 }
 0x223   : >> { %v2288_v9 = vperm.slane %v1887_v44, %v3504_v48  ;;  %v2226_v30 = vperm.slane %v1855_v37, %v3504_v48 }
 0x224   : >> { %v2166_v59 = vperm.slane %v1824_v40, %v3523_v21 }
 0x225   : >> { %v2289_v16 = vsel %vm2057_vm8, %v2288_v9, %v2287_v8  ;;  %v2227_v31 = vsel %vm2057_vm8, %v2226_v30, %v2225_v15 }
 0x226   : >> { %v2167_v44 = vsel %vm2061_vm9, %v2166_v59, %v2165_v58 }
 0x228   : >> { %v1689_v62 = vpop.xlane.xlu2 %1688  ;;  %v1561_v51 = vpop.xlane.xlu1 %1560 }
 0x229   : >> { %v1753_v32 = vpop.xlane.xlu0 %1752  ;;  %v1856_v36 = vadd.f32 %v3305_v49, %v1689_v62  ;;  %v1792_v10 = vadd.f32 %v3305_v49, %v1561_v51 }
 0x22a   : >> { %v1888_v14 = vadd.f32 %v3305_v49, %v1753_v32 }
 0x22b   : >> { %v2228_v52 = vperm.slane %v1856_v36, %v3523_v21  ;;  %v2104_v13 = vperm.slane %v1792_v10, %v3523_v21 }
 0x22c   : >> { %v2290_v24 = vperm.slane %v1888_v14, %v3523_v21 }
 0x22d   : >> { %v2229_v9 = vsel %vm2061_vm9, %v2228_v52, %v2227_v31 }
 0x230   : >> { %v1563_v7 = vpop.xlane.xlu2 %1562  ;;  %v1627_v27 = vpop.xlane.xlu1 %1626 }
 0x231   : >> { %v1691_v33 = vpop.xlane.xlu0 %1690  ;;  %v1793_v54 = vadd.f32 %v3305_v49, %v1563_v7  ;;  %v1825_v34 = vadd.f32 %v3305_v49, %v1627_v27  ;;  %v2105_v7 = vsel %vm2061_vm9, %v2104_v13, %v2103_v29  ;;  %v3869_v27 = vsel %vm2061_vm9, %v2290_v24, %v2289_v16 }
 0x232   : >> { %v1857_v6 = vadd.f32 %v3305_v49, %v1691_v33 }
 0x233   : >> { %v2106_v41 = vperm.slane %v1793_v54, %v3555_v23  ;;  %v2168_v38 = vperm.slane %v1825_v34, %v3555_v23 }
 0x234   : >> { %v2230_v37 = vperm.slane %v1857_v6, %v3555_v23 }
 0x235   : >> { %v2107_v31 = vsel %vm2065_vm10, %v2106_v41, %v2105_v7 }
 0x238   : >> { %v1629_v20 = vpop.xlane.xlu2 %1628  ;;  %v1755_v25 = vpop.xlane.xlu1 %1754 }
 0x239   : >> { %v1565_v42 = vpop.xlane.xlu0 %1564  ;;  %v1826_v26 = vadd.f32 %v3305_v49, %v1629_v20  ;;  %v3863_v30 = vadd.f32 %v3305_v49, %v1755_v25  ;;  %v2169_v25 = vsel %vm2065_vm10, %v2168_v38, %v2167_v44 }
 0x23a   : >> { %v1794_v8 = vadd.f32 %v3305_v49, %v1565_v42 }
 0x23b   : >> { %v2170_v58 = vperm.slane %v1826_v26, %v3573_v45  ;;  %v2292_v40 = vperm.slane %v3863_v30, %v3555_v23 }
 0x23c   : >> { %v2108_v33 = vperm.slane %v1794_v8, %v3573_v45 }
 0x23e   : >> { %v2109_v14 = vsel %vm2069_vm11, %v2108_v33, %v2107_v31 }
 0x240   : >> { %v1695_v53 = vpop.xlane.xlu2 %1694  ;;  %v1693_v39 = vpop.xlane.xlu1 %1692 }
 0x241   : >> { %v1757_v55 = vpop.xlane.xlu0 %1756  ;;  %v1858_v56 = vadd.f32 %v3305_v49, %v1693_v39  ;;  %v1859_v47 = vadd.f32 %v3305_v49, %v1695_v53  ;;  %v2231_v39 = vsel %vm2065_vm10, %v2230_v37, %v2229_v9 }
 0x242   : >> { %v3876_v42 = vadd.f32 %v3305_v49, %v1757_v55 }
 0x243   : >> { %v2232_v21 = vperm.slane %v1858_v56, %v3573_v45  ;;  %v2234_v29 = vperm.slane %v1859_v47, %v3591_v46 }
 0x245   : >> { %v2233_v36 = vsel %vm2069_vm11, %v2232_v21, %v2231_v39 }
 0x246   : >> { %v2235_v52 = vsel %vm2073_vm12, %v2234_v29, %v2233_v36  ;;  %v2293_v29 = vsel %vm2065_vm10, %v2292_v40, %v3869_v27 }
 0x248   : >> { %v1759_v50 = vpop.xlane.xlu2 %1758  ;;  %v1567_v57 = vpop.xlane.xlu1 %1566 }
 0x249   : >> { %v1631_v28 = vpop.xlane.xlu0 %1630  ;;  %v1795_v62 = vadd.f32 %v3305_v49, %v1567_v57  ;;  %v3882_v16 = vadd.f32 %v3305_v49, %v1759_v50 }
 0x24a   : >> { %v1827_v53 = vadd.f32 %v3305_v49, %v1631_v28  ;;  %v2171_v28 = vsel %vm2069_vm11, %v2170_v58, %v2169_v25 }
 0x24b   : >> { %v2110_v10 = vperm.slane %v1795_v62, %v3591_v46 }
 0x24c   : >> { %v2172_v34 = vperm.slane %v1827_v53, %v3591_v46 }
 0x24e   : >> { %v2173_v41 = vsel %vm2073_vm12, %v2172_v34, %v2171_v28 }
 0x250   : >> { %v1569_v48 = vpop.xlane.xlu2 %1568  ;;  %v1633_v63 = vpop.xlane.xlu1 %1632 }
 0x251   : >> { %v1697_v35 = vpop.xlane.xlu0 %1696  ;;  %v1796_v57 = vadd.f32 %v3305_v49, %v1569_v48  ;;  %v1828_v54 = vadd.f32 %v3305_v49, %v1633_v63  ;;  %v2294_v48 = vperm.slane %v3876_v42, %v3573_v45 }
 0x252   : >> { %v1860_v50 = vadd.f32 %v3305_v49, %v1697_v35  ;;  %v2111_v35 = vsel %vm2073_vm12, %v2110_v10, %v2109_v14 }
 0x253   : >> { %v2112_v6 = vperm.slane %v1796_v57, %v3610_v18 }
 0x254   : >> { %v2236_v24 = vperm.slane %v1860_v50, %v3610_v18 }
 0x255   : >> { %v2113_v47 = vsel %vm2077_vm13, %v2112_v6, %v2111_v35 }
 0x256   : >> { %v2237_v7 = vsel %vm2077_vm13, %v2236_v24, %v2235_v52 }
 0x258   : >> { %v1635_v12 = vpop.xlane.xlu2 %1634  ;;  %v3842_v60 = vpop.xlane.xlu1 %1760 }
 0x259   : >> { %v1571_v15 = vpop.xlane.xlu0 %1570  ;;  %v1829_v23 = vadd.f32 %v3305_v49, %v1635_v12  ;;  %v2174_v12 = vperm.slane %v1828_v54, %v3610_v18  ;;  %v1892_v9 = vadd.f32 %v3305_v49, %v3842_v60 }
 0x25a   : >> { %v1797_v55 = vadd.f32 %v3305_v49, %v1571_v15  ;;  %v2296_v15 = vperm.slane %v3882_v16, %v3591_v46 }
 0x25b   : >> { %v2176_v38 = vperm.slane %v1829_v23, %v3641_v22  ;;  %v2298_v42 = vperm.slane %v1892_v9, %v3610_v18 }
 0x25c   : >> { %v2114_v56 = vperm.slane %v1797_v55, %v3641_v22 }
 0x25e   : >> { %v2115_v62 = vsel %vm2081_vm14, %v2114_v56, %v2113_v47 }
 0x260   : >> { %v1701_v51 = vpop.xlane.xlu2 %1700  ;;  %v1699_v32 = vpop.xlane.xlu1 %1698 }
 0x261   : >> { %v1637_v20 = vpop.xlane.xlu0 %1636  ;;  %v1861_v59 = vadd.f32 %v3305_v49, %v1699_v32  ;;  %v1862_v46 = vadd.f32 %v3305_v49, %v1701_v51  ;;  %v2175_v32 = vsel %vm2077_vm13, %v2174_v12, %v2173_v41 }
 0x262   : >> { %v1830_v63 = vadd.f32 %v3305_v49, %v1637_v20  ;;  %v2177_v60 = vsel %vm2081_vm14, %v2176_v38, %v2175_v32 }
 0x263   : >> { %v2238_v44 = vperm.slane %v1861_v59, %v3641_v22  ;;  %v2240_v58 = vperm.slane %v1862_v46, %v3665_v19 }
 0x264   : >> { %v2178_v30 = vperm.slane %v1830_v63, %v3665_v19 }
 0x265   : >> { %v2239_v20 = vsel %vm2081_vm14, %v2238_v44, %v2237_v7 }
 0x266   : >> { %v2179_v53 = vsel %vm2085_vm15, %v2178_v30, %v2177_v60  ;;  %v2241_v18 = vsel %vm2085_vm15, %v2240_v58, %v2239_v20 }
 0x268   : >> { %v1733_v45 = vpop.xlane.xlu2 %1732  ;;  %v1573_v13 = vpop.xlane.xlu1 %1572 }
 0x269   : >> { %v1798_v26 = vadd.f32 %v3305_v49, %v1573_v13  ;;  %v1763_v8 = vpop.xlane.xlu0 %1762  ;;  %v1878_v37 = vadd.f32 %v3305_v49, %v1733_v45 }
 0x26a   : >> { %v1893_v51 = vadd.f32 %v3305_v49, %v1763_v8 }
 0x26b   : >> { %v2116_v21 = vperm.slane %v1798_v26, %v3665_v19  ;;  %v2271_v31 = vperm.slane %v1878_v37, %v3665_v19 }
 0x26c   : >> { %v2300_v57 = vperm.slane %v1893_v51, %v3641_v22 }
 0x26d   : >> { %v2117_v33 = vsel %vm2085_vm15, %v2116_v21, %v2115_v62  ;;  %v2272_v27 = vsel %vm2085_vm15, %v2271_v31, %v3660_v61 }
 0x26e   : >> { %v2305_v25 = vsel %vm2304_vm0, %v2117_v33, %v3682_v43  ;;  %v2295_v43 = vsel %vm2069_vm11, %v2294_v48, %v2293_v29 }
 0x26f   : >> { %v2307_v39 = vsel %vm2306_vm1, %v3695_v11, %v2305_v25  ;;  %v2297_v55 = vsel %vm2073_vm12, %v2296_v15, %v2295_v43 }
 0x270   : >> { %v2309_v16 = vsel %vm2308_vm2, %v2179_v53, %v2307_v39  ;;  %v1765_v36 = vpop.xlane.xlu1 %1764  ;;  %v2299_v22 = vsel %vm2077_vm13, %v2298_v42, %v2297_v55 }
 0x271   : >> { %v1894_v10 = vadd.f32 %v3305_v49, %v1765_v36  ;;  %v2311_v11 = vsel %vm2310_vm3, %v3698_v17, %v2309_v16  ;;  %v2301_v54 = vsel %vm2081_vm14, %v2300_v57, %v2299_v22 }
 0x272   : >> { %v2313_v40 = vsel %vm2312_vm4, %v2241_v18, %v2311_v11 }
 0x273   : >> { %v2302_v28 = vperm.slane %v1894_v10, %v3665_v19  ;;  %v2315_v14 = vsel %vm2314_vm5, %v2272_v27, %v2313_v40  ;;  %259 = sbr.rel (!%p257_p11) target bundleno = 25 (0x19), region = 84 }
 0x275   : >> { %v2303_v49 = vsel %vm2085_vm15, %v2302_v28, %v2301_v54 }
 0x276   : >> { %v2317_v50 = vsel %vm2316_vm6, %v2303_v49, %v2315_v14 }
 0x277   : >> { %2320 = vst [vmem:[%s2319_s18] sm:$0xff] %v2317_v50 }
 0x278   : > { %2897 = shalt.err (!%p2894_p4)
}
 0x279   : > { %s2942_s6 = smov 128   ;;  %s2943_s16 = smov 8  }
 0x27a   : > { %2821 = dma.vmem_to_hbm [thread:$0]  (%p3015_p5), %s2335_s24, 384, %s2337_s7, %s2322_s14, %s2942_s6, %s2942_s6, %s2943_s16  }
 0x27b PF: > { %p2827_p7 = scmp.ge.s32.totalorder %s2936_s23, 2  ;;  %s2351_s17 = sand.u32 1, %s2924_s20  }
 0x27c   : > { %s2352_s18 = scalar_lea.sflag [#allocation4], %s2351_s17 }
 0x27d   : > { %p2824_p8 = pnand %p2827_p7, %p3019_p6 }
 0x27f   : > { %p2825_p9 = pneg %p2824_p8 }
 0x281   : > { %2919 = dma.done.wait (%p2825_p9), %s2352_s18, 384  }
 0x282   : > { %2921 = vsyncadd (%p2825_p9), %s2352_s18, 4294966912  ;;  %p16_p10 = scmp.ge.s32.totalorder %s3002_s25, 4   ;;  %s3999_s20 = smov %s2928_s21 }
 0x283   : > { %s4000_s21 = smov %s2932_s22  ;;  %s4001_s22 = smov %s3013_s28 }
 0x284   : > { %s4002_s23 = smov %s3002_s25  ;;  %18 = sbr.rel (!%p16_p10) target bundleno = 5 (0x5), region = 95 }
 0x289   :  { %2358 = vsyncpa [#allocation4], 1 }
 0x28a   :  { %2360 = vsyncpa [#allocation4 + $0x1], 1 }

</bundles_post_ra>
